<compile_context>
chip_gen: v7x
topology: tpu7x:2x2x1
jax: 0.10.0
libtpu: 0.0.40
codegen_flags: <defaults>
</compile_context>

<pallas_src>
import math

import jax
import jax.numpy as jnp
from jax.experimental import pallas as pl
from jax.experimental.pallas import tpu as pltpu

# ---- scaled-down ALMBert hyper-parameters -----------------------------------
B = 2           # batch
S = 8           # sequence length (real module implies S=75: Linear(75+75, n))
H = 32          # hidden size     (BERT hidden = 768 in the real module)
NH = 4          # attention heads (same as the module)
HD = H // NH    # head dim
D2 = 16         # ctx_lin / asp_lin out features (768 -> 64 in the real module)
NC = 3          # n_classes
VOCAB = 64
EPS = 1e-5      # PyTorch BatchNorm default eps
BS = B * S      # folded batch*seq rows
SLAB_LANES = 256

# ---- packed-parameter slab layout (row offsets) ------------------------------
# bf16 weight slab [W_ROWS, 256]; everything stored in right-multiply form.
# All row offsets / extents are multiples of 16 (bf16 sublane packing).
R_WPROJ = 0                   # [H, 6H]   fused in-proj: aQ|cQ|cK|cV|aK|aV (Q pre-scaled)
R_WBIG = R_WPROJ + H          # [2H, 2H]  block-diag out-proj: diag(a_wout.T, c_wout.T)
R_WLIN = R_WBIG + 2 * H       # [2H, 2D2] block-diag BN1-folded Linear
R_WPOOL = R_WLIN + 2 * H      # [2D2, 2]  BN2 + AvgPool folded pooling vectors
W_ROWS = R_WPOOL + 2 * D2     # 192

# f32 bias / coefficient slab [C_ROWS, 256]
C_BPROJ = 0     # [1, 6H]     fused in-proj bias (Q parts pre-scaled)
C_BOUT = 1      # [1, 2H]     out-proj biases  (asp | ctx)
C_BLIN = 2      # [1, 2D2]    BN1-folded Linear bias
C_CONST = 3     # [1, NC]     folded constant of the final Linear
C_SEL = 4       # [B, B*S]    per-batch row-sum selection matrix
C_F = 8         # [B*S, 2NC]  final-Linear coefficients (asp | ctx) per row
C_MASK = 24     # [BS, BS]    additive block-diagonal batch mask (0 / -1e9)
C_ROWS = C_MASK + BS          # 40


# ---- fused Pallas kernel: whole post-BERT head, whole batch ------------------
def alm_head_kernel(ctx_ref, asp_ref, w_ref, c_ref, out_ref, att_ref):
    # ctx_ref / asp_ref : [BS, H] f32
    # w_ref             : [W_ROWS, 256] bf16 packed weights
    # c_ref             : [C_ROWS, 256] f32 packed biases / coefficients
    # att_ref (scratch) : [BS, 2H] f32 lane-packed per-head attention outputs
    x_all = jnp.concatenate([ctx_ref[...], asp_ref[...]], axis=0)        # [2BS, H] f32
    x_all = x_all.astype(jnp.bfloat16)

    # ---- ONE fused input-projection MXU pass: [2BS, H] @ [H, 6H] -------------
    proj = jnp.dot(x_all, w_ref[R_WPROJ:R_WPROJ + H, 0:6 * H],
                   preferred_element_type=jnp.float32) \
        + c_ref[C_BPROJ:C_BPROJ + 1, 0:6 * H]
    proj = proj.astype(jnp.bfloat16)
    ctx_p = proj[0:BS, :]          # ctx rows:  lanes aQ | cQ | cK | cV | (unused)
    asp_p = proj[BS:2 * BS, :]     # asp rows:  lanes (unused)       | aK | aV

    # precomputed block-diagonal batch mask (hoisted, from the f32 slab)
    neg = c_ref[C_MASK:C_MASK + BS, 0:BS]                                # [BS, BS]

    # ---- 2 branches x 4 heads, statically unrolled, independent chains -------
    for t in range(2 * NH):
        h = t % NH
        if t < NH:      # asp_att: Q = context, K = V = aspect
            q = ctx_p[:, h * HD:(h + 1) * HD]
            k = asp_p[:, 4 * H + h * HD:4 * H + (h + 1) * HD]
            v = asp_p[:, 5 * H + h * HD:5 * H + (h + 1) * HD]
        else:           # ctx_att: Q = K = V = context
            q = ctx_p[:, H + h * HD:H + (h + 1) * HD]
            k = ctx_p[:, 2 * H + h * HD:2 * H + (h + 1) * HD]
            v = ctx_p[:, 3 * H + h * HD:3 * H + (h + 1) * HD]
        # scores (Q already pre-scaled by 1/sqrt(HD) in the packed weights)
        s = jax.lax.dot_general(q, k, (((1,), (1,)), ((), ())),
                                preferred_element_type=jnp.float32) + neg
        s = s - jnp.max(s, axis=-1, keepdims=True)
        e = jnp.exp(s)
        p = e * pl.reciprocal(jnp.sum(e, axis=-1, keepdims=True), approx=True)
        oh = jnp.dot(p.astype(jnp.bfloat16), v,
                     preferred_element_type=jnp.float32)                 # [BS, HD]
        # lane-packed store: [asp heads 0..3 | ctx heads 0..3] -> [BS, 2H]
        att_ref[:, t * HD:(t + 1) * HD] = oh

    # ---- single block-diag out-projection matmul (replaces 8 K=8 matmuls) ----
    att = att_ref[...].astype(jnp.bfloat16)                              # [BS, 2H]
    acc = jnp.dot(att, w_ref[R_WBIG:R_WBIG + 2 * H, 0:2 * H],
                  preferred_element_type=jnp.float32) \
        + c_ref[C_BOUT:C_BOUT + 1, 0:2 * H]                              # [BS, 2H]

    # ---- BN1 o Linear (folded, block-diag) + ReLU ----------------------------
    y = jnp.dot(acc.astype(jnp.bfloat16),
                w_ref[R_WLIN:R_WLIN + 2 * H, 0:2 * D2],
                preferred_element_type=jnp.float32) \
        + c_ref[C_BLIN:C_BLIN + 1, 0:2 * D2]
    y = jnp.maximum(y, 0.0)                                              # [BS, 2*D2]

    # ---- BN2 o AvgPool (folded into one pooling matmul) ----------------------
    pooled = jnp.dot(y.astype(jnp.bfloat16),
                     w_ref[R_WPOOL:R_WPOOL + 2 * D2, 0:2],
                     preferred_element_type=jnp.float32)                 # [BS, 2]

    # ---- final Linear: per-row coefficients + per-batch row-sum --------------
    fco = c_ref[C_F:C_F + BS, 0:2 * NC]                                  # [BS, 2NC]
    contrib = pooled[:, 0:1] * fco[:, 0:NC] + pooled[:, 1:2] * fco[:, NC:2 * NC]
    sel = c_ref[C_SEL:C_SEL + B, 0:BS]                                   # [B, BS]
    logits = jnp.dot(sel, contrib, preferred_element_type=jnp.float32) \
        + c_ref[C_CONST:C_CONST + 1, 0:NC]                               # [B, NC]
    out_ref[...] = logits


@jax.jit
def alm_bert_head(context, aspect, w_slab, c_slab):
    """context/aspect: [B, S, H] f32.  Returns logits [B, NC]."""
    # reshape is a free bitcast; NO concat/cast materialization outside the kernel
    return pl.pallas_call(
        alm_head_kernel,
        out_shape=jax.ShapeDtypeStruct((B, NC), jnp.float32),
        scratch_shapes=[pltpu.VMEM((BS, 2 * H), jnp.float32)],
    )(context.reshape(BS, H), aspect.reshape(BS, H), w_slab, c_slab)


# ---- deterministic parameter init (shapes follow the module __init__) --------
def init_params(key):
    ks = list(jax.random.split(key, 40))
    it = iter(ks)

    def nrm(shape, scale=0.05):
        return scale * jax.random.normal(next(it), shape, jnp.float32)

    def mha_params():
        w_in = nrm((3 * H, H))          # in_proj_weight (q;k;v stacked)
        b_in = nrm((1, 3 * H))          # in_proj_bias
        w_out = nrm((H, H))             # out_proj.weight
        b_out = nrm((1, H))             # out_proj.bias
        return [w_in, b_in, w_out, b_out]

    def bn_params(c):
        w = 1.0 + 0.1 * jax.random.normal(next(it), (c,), jnp.float32)
        b = 0.1 * jax.random.normal(next(it), (c,), jnp.float32)
        rm = 0.1 * jax.random.normal(next(it), (c,), jnp.float32)
        rv = 1.0 + 0.1 * jax.random.uniform(next(it), (c,), jnp.float32)
        return [jnp.stack([w, b, rm, rv], axis=0)]       # [4, c]

    def lin_params(cout, cin):
        return [nrm((cout, cin)), nrm((1, cout))]

    params = []
    for _ in range(2):                                   # asp branch, then ctx branch
        params += mha_params()
        params += bn_params(H)                           # *_bn1
        params += lin_params(D2, H)                      # *_lin
        params += bn_params(D2)                          # *_bn2
    fin_w = nrm((NC, 2 * S))                             # Linear(2S, n_classes)
    fin_b = nrm((NC, 1))
    params += [fin_w, fin_b]

    emb = 0.5 * jax.random.normal(next(it), (VOCAB, H), jnp.float32)
    pos = 0.1 * jax.random.normal(next(it), (S, H), jnp.float32)
    return params, emb, pos


# ---- host-side parameter packing / folding -----------------------------------
def pack_params(params):
    (a_win, a_bin, a_wout, a_bout, a_bn1, a_lw, a_lb, a_bn2,
     c_win, c_bin, c_wout, c_bout, c_bn1, c_lw, c_lb, c_bn2,
     fin_w, fin_b) = params
    scale = 1.0 / math.sqrt(HD)

    # fused in-proj (right-multiply form): [aQ | cQ | cK | cV | aK | aV],
    # Q columns carry the 1/sqrt(HD) softmax scale
    wproj = jnp.concatenate([a_win[0:H] * scale, c_win[0:H] * scale,
                             c_win[H:2 * H], c_win[2 * H:3 * H],
                             a_win[H:2 * H], a_win[2 * H:3 * H]], axis=0).T   # [H, 6H]
    bproj = jnp.concatenate([a_bin[0, 0:H] * scale, c_bin[0, 0:H] * scale,
                             c_bin[0, H:2 * H], c_bin[0, 2 * H:3 * H],
                             a_bin[0, H:2 * H], a_bin[0, 2 * H:3 * H]], axis=0)  # [6H]

    # block-diag out-proj (right-multiply form) + biases
    wbig = jnp.zeros((2 * H, 2 * H), jnp.float32)
    wbig = wbig.at[0:H, 0:H].set(a_wout.T)
    wbig = wbig.at[H:2 * H, H:2 * H].set(c_wout.T)
    bout = jnp.concatenate([a_bout[0], c_bout[0]], axis=0)          # [2H]

    # BatchNorm1d(eval) folded into the following Linear
    def fold_bn_lin(bn1, lw, lb):
        g, b, m, v = bn1[0], bn1[1], bn1[2], bn1[3]
        s = g * jax.lax.rsqrt(v + EPS)
        return lw * s[None, :], lb[0] + lw @ (b - m * s)

    a_wf, a_bf = fold_bn_lin(a_bn1, a_lw, a_lb)
    c_wf, c_bf = fold_bn_lin(c_bn1, c_lw, c_lb)
    wlin = jnp.zeros((2 * H, 2 * D2), jnp.float32)
    wlin = wlin.at[0:H, 0:D2].set(a_wf.T)
    wlin = wlin.at[H:2 * H, D2:2 * D2].set(c_wf.T)
    blin = jnp.concatenate([a_bf, c_bf], axis=0)                    # [2D2]

    # BatchNorm1d(eval) + AvgPool(full width) folded into a pooling vector
    def fold_bn_pool(bn2):
        g, b, m, v = bn2[0], bn2[1], bn2[2], bn2[3]
        s = g * jax.lax.rsqrt(v + EPS)
        return s / D2, jnp.mean(b - m * s)

    a_wp, a_cp = fold_bn_pool(a_bn2)
    c_wp, c_cp = fold_bn_pool(c_bn2)
    wpool = jnp.zeros((2 * D2, 2), jnp.float32)
    wpool = wpool.at[0:D2, 0].set(a_wp)
    wpool = wpool.at[D2:2 * D2, 1].set(c_wp)

    # final Linear: per-(s, branch) coefficients + folded constant
    fa = fin_w[:, 0:S].T                                 # [S, NC]   (asp part)
    fc = fin_w[:, S:2 * S].T                             # [S, NC]   (ctx part)
    fcoef = jnp.concatenate([jnp.tile(fa, (B, 1)), jnp.tile(fc, (B, 1))], axis=1)  # [BS, 2NC]
    const = (fin_b[:, 0]
             + a_cp * jnp.sum(fin_w[:, 0:S], axis=1)
             + c_cp * jnp.sum(fin_w[:, S:2 * S], axis=1))            # [NC]

    sel = jnp.zeros((B, BS), jnp.float32)
    for bi in range(B):
        sel = sel.at[bi, bi * S:(bi + 1) * S].set(1.0)

    # block-diagonal batch mask (precomputed host-side, per perf review)
    rr = jnp.arange(BS)[:, None] // S
    cc = jnp.arange(BS)[None, :] // S
    mask = jnp.where(rr == cc, 0.0, -1e9).astype(jnp.float32)        # [BS, BS]

    # ---- pack into the two slabs -------------------------------------------
    w_slab = jnp.zeros((W_ROWS, SLAB_LANES), jnp.float32)
    w_slab = w_slab.at[R_WPROJ:R_WPROJ + H, 0:6 * H].set(wproj)
    w_slab = w_slab.at[R_WBIG:R_WBIG + 2 * H, 0:2 * H].set(wbig)
    w_slab = w_slab.at[R_WLIN:R_WLIN + 2 * H, 0:2 * D2].set(wlin)
    w_slab = w_slab.at[R_WPOOL:R_WPOOL + 2 * D2, 0:2].set(wpool)
    w_slab = w_slab.astype(jnp.bfloat16)

    c_slab = jnp.zeros((C_ROWS, SLAB_LANES), jnp.float32)
    c_slab = c_slab.at[C_BPROJ, 0:6 * H].set(bproj)
    c_slab = c_slab.at[C_BOUT, 0:2 * H].set(bout)
    c_slab = c_slab.at[C_BLIN, 0:2 * D2].set(blin)
    c_slab = c_slab.at[C_CONST, 0:NC].set(const)
    c_slab = c_slab.at[C_SEL:C_SEL + B, 0:BS].set(sel)
    c_slab = c_slab.at[C_F:C_F + BS, 0:2 * NC].set(fcoef)
    c_slab = c_slab.at[C_MASK:C_MASK + BS, 0:BS].set(mask)
    return w_slab, c_slab


def fake_bert(ids, attn_mask, emb, pos):
    # TODO(synk): frozen pretrained `bert-base-cased` encoder cannot be reproduced
    # in-script; replaced by a deterministic embedding + positional stand-in that
    # produces the same [B, S, H] last_hidden_state interface.
    h = emb[ids] + pos[None, :, :]
    return h * attn_mask[:, :, None].astype(jnp.float32)


# ---- pure-JAX reference of the fused head (for correctness check) ------------
def ref_forward(context, aspect, params):
    (a_win, a_bin, a_wout, a_bout, a_bn1, a_lw, a_lb, a_bn2,
     c_win, c_bin, c_wout, c_bout, c_bn1, c_lw, c_lb, c_bn2,
     fin_w, fin_b) = params

    def mha(q, k, v, w_in, b_in, w_out, b_out):
        qp = q @ w_in[:H].T + b_in[:, :H]
        kp = k @ w_in[H:2 * H].T + b_in[:, H:2 * H]
        vp = v @ w_in[2 * H:].T + b_in[:, 2 * H:]
        sp = lambda x: x.reshape(B, S, NH, HD).transpose(0, 2, 1, 3)
        qh, kh, vh = sp(qp), sp(kp), sp(vp)
        sc = jnp.einsum("bhqd,bhkd->bhqk", qh, kh) / math.sqrt(HD)
        p = jax.nn.softmax(sc, axis=-1)
        o = jnp.einsum("bhqk,bhkd->bhqd", p, vh).transpose(0, 2, 1, 3).reshape(B, S, H)
        return o @ w_out.T + b_out[0]

    def branch(x, bn1, lw, lb, bn2):
        x = (x - bn1[2]) * jax.lax.rsqrt(bn1[3] + EPS) * bn1[0] + bn1[1]
        x = jnp.maximum(x @ lw.T + lb[0], 0.0)
        x = (x - bn2[2]) * jax.lax.rsqrt(bn2[3] + EPS) * bn2[0] + bn2[1]
        return jnp.mean(x, axis=-1)                      # [B, S]

    asp_att = mha(context, aspect, aspect, a_win, a_bin, a_wout, a_bout)
    ctx_att = mha(context, context, context, c_win, c_bin, c_wout, c_bout)
    feat = jnp.concatenate([branch(asp_att, a_bn1, a_lw, a_lb, a_bn2),
                            branch(ctx_att, c_bn1, c_lw, c_lb, c_bn2)], axis=1)
    return feat @ fin_w.T + fin_b[:, 0]


if __name__ == "__main__":
    key = jax.random.PRNGKey(0)
    k_tid, k_aid, k_par = jax.random.split(key, 3)

    text_ids = jax.random.randint(k_tid, (B, S), 0, VOCAB)
    aspect_ids = jax.random.randint(k_aid, (B, S), 0, VOCAB)
    text_attention = jnp.ones((B, S), jnp.int32)
    aspect_attention = jnp.ones((B, S), jnp.int32).at[:, S // 2:].set(0)

    params, emb, pos = init_params(k_par)
    w_slab, c_slab = pack_params(params)

    # Frozen-BERT stand-in (plain JAX glue outside the kernel).
    context = fake_bert(text_ids, text_attention, emb, pos)     # [B, S, H]
    aspect = fake_bert(aspect_ids, aspect_attention, emb, pos)  # [B, S, H]

    out = alm_bert_head(context, aspect, w_slab, c_slab)        # [B, NC]
    jax.block_until_ready(out)

    ref = ref_forward(context, aspect, params)
    assert out.shape == (B, NC), out.shape
    assert bool(jnp.all(jnp.isfinite(out)))
    assert bool(jnp.allclose(out, ref, atol=5e-2, rtol=5e-2)), (out, ref)

    print("KERNEL_OK")
</pallas_src>

<mosaic_0001>
module attributes {stable_mosaic.version = 11 : i64} {
  func.func @alm_head_kernel(%arg0: memref<16x32xf32, #tpu.memory_space<vmem>>, %arg1: memref<16x32xf32, #tpu.memory_space<vmem>>, %arg2: memref<192x256xbf16, #tpu.memory_space<vmem>>, %arg3: memref<40x256xf32, #tpu.memory_space<vmem>>, %arg4: memref<2x3xf32, #tpu.memory_space<vmem>>, %arg5: memref<16x64xf32, #tpu.memory_space<vmem>>) attributes {dimension_semantics = [], scalar_prefetch = 0 : i64, scratch_operands = 1 : i64, tpu.core_type = #tpu.core_type<tc>} {
    %c0 = arith.constant 0 : index
    %c0_0 = arith.constant 0 : index
    %0 = vector.load %arg0[%c0, %c0_0] : memref<16x32xf32, #tpu.memory_space<vmem>>, vector<16x32xf32>
    %c0_1 = arith.constant 0 : index
    %c0_2 = arith.constant 0 : index
    %1 = vector.load %arg1[%c0_1, %c0_2] : memref<16x32xf32, #tpu.memory_space<vmem>>, vector<16x32xf32>
    %2 = tpu.concatenate %0, %1 in 0 : vector<16x32xf32>, vector<16x32xf32> -> vector<32x32xf32>
    %3 = arith.truncf %2 : vector<32x32xf32> to vector<32x32xbf16>
    %c0_3 = arith.constant 0 : index
    %c0_4 = arith.constant 0 : index
    %4 = vector.load %arg2[%c0_3, %c0_4] : memref<192x256xbf16, #tpu.memory_space<vmem>>, vector<32x192xbf16>
    %cst = arith.constant dense<0.000000e+00> : vector<32x192xf32>
    %5 = tpu.matmul %3, %4, %cst {dimension_numbers = #tpu.dot_dimension_numbers<[1], [0], [0], [1], [0, 0, 1, 1], [], []>} : vector<32x32xbf16>, vector<32x192xbf16>, vector<32x192xf32> -> vector<32x192xf32>
    %c0_5 = arith.constant 0 : index
    %c0_6 = arith.constant 0 : index
    %6 = vector.load %arg3[%c0_5, %c0_6] : memref<40x256xf32, #tpu.memory_space<vmem>>, vector<1x192xf32>
    %7 = vector.broadcast %6 : vector<1x192xf32> to vector<32x192xf32>
    %8 = arith.addf %5, %7 : vector<32x192xf32>
    %9 = arith.truncf %8 : vector<32x192xf32> to vector<32x192xbf16>
    %10 = vector.extract_strided_slice %9 {offsets = [0, 0], sizes = [16, 192], strides = [1, 1]} : vector<32x192xbf16> to vector<16x192xbf16>
    %11 = vector.extract_strided_slice %9 {offsets = [16, 0], sizes = [16, 192], strides = [1, 1]} : vector<32x192xbf16> to vector<16x192xbf16>
    %c24 = arith.constant 24 : index
    %c0_7 = arith.constant 0 : index
    %12 = vector.load %arg3[%c24, %c0_7] : memref<40x256xf32, #tpu.memory_space<vmem>>, vector<16x16xf32>
    %13 = vector.extract_strided_slice %10 {offsets = [0, 0], sizes = [16, 8], strides = [1, 1]} : vector<16x192xbf16> to vector<16x8xbf16>
    %14 = vector.extract_strided_slice %11 {offsets = [0, 128], sizes = [16, 8], strides = [1, 1]} : vector<16x192xbf16> to vector<16x8xbf16>
    %15 = vector.extract_strided_slice %11 {offsets = [0, 160], sizes = [16, 8], strides = [1, 1]} : vector<16x192xbf16> to vector<16x8xbf16>
    %cst_8 = arith.constant dense<0.000000e+00> : vector<16x16xf32>
    %16 = tpu.matmul %13, %14, %cst_8 {dimension_numbers = #tpu.dot_dimension_numbers<[1], [1], [0], [0], [0, 0, 1, 0], [], []>} : vector<16x8xbf16>, vector<16x8xbf16>, vector<16x16xf32> -> vector<16x16xf32>
    %17 = arith.addf %16, %12 : vector<16x16xf32>
    %cst_9 = arith.constant dense<0xFF800000> : vector<16xf32>
    %18 = vector.multi_reduction <maximumf>, %17, %cst_9 [1] : vector<16x16xf32> to vector<16xf32>
    %19 = vector.shape_cast %18 : vector<16xf32> to vector<16x1xf32>
    %20 = vector.broadcast %19 : vector<16x1xf32> to vector<16x16xf32>
    %21 = arith.subf %17, %20 : vector<16x16xf32>
    %22 = math.exp %21 : vector<16x16xf32>
    %cst_10 = arith.constant dense<0.000000e+00> : vector<16xf32>
    %23 = vector.multi_reduction <add>, %22, %cst_10 [1] : vector<16x16xf32> to vector<16xf32>
    %24 = vector.shape_cast %23 : vector<16xf32> to vector<16x1xf32>
    %25 = tpu.reciprocal %24 {approx = true} : vector<16x1xf32> -> vector<16x1xf32>
    %26 = vector.broadcast %25 : vector<16x1xf32> to vector<16x16xf32>
    %27 = arith.mulf %22, %26 : vector<16x16xf32>
    %28 = arith.truncf %27 : vector<16x16xf32> to vector<16x16xbf16>
    %cst_11 = arith.constant dense<0.000000e+00> : vector<16x8xf32>
    %29 = tpu.matmul %28, %15, %cst_11 {dimension_numbers = #tpu.dot_dimension_numbers<[1], [0], [0], [1], [0, 0, 1, 1], [], []>} : vector<16x16xbf16>, vector<16x8xbf16>, vector<16x8xf32> -> vector<16x8xf32>
    %c0_12 = arith.constant 0 : index
    %c0_13 = arith.constant 0 : index
    %30 = vector.load %arg5[%c0_12, %c0_13] : memref<16x64xf32, #tpu.memory_space<vmem>>, vector<16x8xf32>
    tpu.vector_store %arg5[%c0_12, %c0_13], %29 {strides = array<i32>} : memref<16x64xf32, #tpu.memory_space<vmem>>, vector<16x8xf32>,
    %31 = vector.extract_strided_slice %10 {offsets = [0, 8], sizes = [16, 8], strides = [1, 1]} : vector<16x192xbf16> to vector<16x8xbf16>
    %32 = vector.extract_strided_slice %11 {offsets = [0, 136], sizes = [16, 8], strides = [1, 1]} : vector<16x192xbf16> to vector<16x8xbf16>
    %33 = vector.extract_strided_slice %11 {offsets = [0, 168], sizes = [16, 8], strides = [1, 1]} : vector<16x192xbf16> to vector<16x8xbf16>
    %cst_14 = arith.constant dense<0.000000e+00> : vector<16x16xf32>
    %34 = tpu.matmul %31, %32, %cst_14 {dimension_numbers = #tpu.dot_dimension_numbers<[1], [1], [0], [0], [0, 0, 1, 0], [], []>} : vector<16x8xbf16>, vector<16x8xbf16>, vector<16x16xf32> -> vector<16x16xf32>
    %35 = arith.addf %34, %12 : vector<16x16xf32>
    %cst_15 = arith.constant dense<0xFF800000> : vector<16xf32>
    %36 = vector.multi_reduction <maximumf>, %35, %cst_15 [1] : vector<16x16xf32> to vector<16xf32>
    %37 = vector.shape_cast %36 : vector<16xf32> to vector<16x1xf32>
    %38 = vector.broadcast %37 : vector<16x1xf32> to vector<16x16xf32>
    %39 = arith.subf %35, %38 : vector<16x16xf32>
    %40 = math.exp %39 : vector<16x16xf32>
    %cst_16 = arith.constant dense<0.000000e+00> : vector<16xf32>
    %41 = vector.multi_reduction <add>, %40, %cst_16 [1] : vector<16x16xf32> to vector<16xf32>
    %42 = vector.shape_cast %41 : vector<16xf32> to vector<16x1xf32>
    %43 = tpu.reciprocal %42 {approx = true} : vector<16x1xf32> -> vector<16x1xf32>
    %44 = vector.broadcast %43 : vector<16x1xf32> to vector<16x16xf32>
    %45 = arith.mulf %40, %44 : vector<16x16xf32>
    %46 = arith.truncf %45 : vector<16x16xf32> to vector<16x16xbf16>
    %cst_17 = arith.constant dense<0.000000e+00> : vector<16x8xf32>
    %47 = tpu.matmul %46, %33, %cst_17 {dimension_numbers = #tpu.dot_dimension_numbers<[1], [0], [0], [1], [0, 0, 1, 1], [], []>} : vector<16x16xbf16>, vector<16x8xbf16>, vector<16x8xf32> -> vector<16x8xf32>
    %c0_18 = arith.constant 0 : index
    %c8 = arith.constant 8 : index
    %48 = vector.load %arg5[%c0_18, %c8] : memref<16x64xf32, #tpu.memory_space<vmem>>, vector<16x8xf32>
    tpu.vector_store %arg5[%c0_18, %c8], %47 {strides = array<i32>} : memref<16x64xf32, #tpu.memory_space<vmem>>, vector<16x8xf32>,
    %49 = vector.extract_strided_slice %10 {offsets = [0, 16], sizes = [16, 8], strides = [1, 1]} : vector<16x192xbf16> to vector<16x8xbf16>
    %50 = vector.extract_strided_slice %11 {offsets = [0, 144], sizes = [16, 8], strides = [1, 1]} : vector<16x192xbf16> to vector<16x8xbf16>
    %51 = vector.extract_strided_slice %11 {offsets = [0, 176], sizes = [16, 8], strides = [1, 1]} : vector<16x192xbf16> to vector<16x8xbf16>
    %cst_19 = arith.constant dense<0.000000e+00> : vector<16x16xf32>
    %52 = tpu.matmul %49, %50, %cst_19 {dimension_numbers = #tpu.dot_dimension_numbers<[1], [1], [0], [0], [0, 0, 1, 0], [], []>} : vector<16x8xbf16>, vector<16x8xbf16>, vector<16x16xf32> -> vector<16x16xf32>
    %53 = arith.addf %52, %12 : vector<16x16xf32>
    %cst_20 = arith.constant dense<0xFF800000> : vector<16xf32>
    %54 = vector.multi_reduction <maximumf>, %53, %cst_20 [1] : vector<16x16xf32> to vector<16xf32>
    %55 = vector.shape_cast %54 : vector<16xf32> to vector<16x1xf32>
    %56 = vector.broadcast %55 : vector<16x1xf32> to vector<16x16xf32>
    %57 = arith.subf %53, %56 : vector<16x16xf32>
    %58 = math.exp %57 : vector<16x16xf32>
    %cst_21 = arith.constant dense<0.000000e+00> : vector<16xf32>
    %59 = vector.multi_reduction <add>, %58, %cst_21 [1] : vector<16x16xf32> to vector<16xf32>
    %60 = vector.shape_cast %59 : vector<16xf32> to vector<16x1xf32>
    %61 = tpu.reciprocal %60 {approx = true} : vector<16x1xf32> -> vector<16x1xf32>
    %62 = vector.broadcast %61 : vector<16x1xf32> to vector<16x16xf32>
    %63 = arith.mulf %58, %62 : vector<16x16xf32>
    %64 = arith.truncf %63 : vector<16x16xf32> to vector<16x16xbf16>
    %cst_22 = arith.constant dense<0.000000e+00> : vector<16x8xf32>
    %65 = tpu.matmul %64, %51, %cst_22 {dimension_numbers = #tpu.dot_dimension_numbers<[1], [0], [0], [1], [0, 0, 1, 1], [], []>} : vector<16x16xbf16>, vector<16x8xbf16>, vector<16x8xf32> -> vector<16x8xf32>
    %c0_23 = arith.constant 0 : index
    %c16 = arith.constant 16 : index
    %66 = vector.load %arg5[%c0_23, %c16] : memref<16x64xf32, #tpu.memory_space<vmem>>, vector<16x8xf32>
    tpu.vector_store %arg5[%c0_23, %c16], %65 {strides = array<i32>} : memref<16x64xf32, #tpu.memory_space<vmem>>, vector<16x8xf32>,
    %67 = vector.extract_strided_slice %10 {offsets = [0, 24], sizes = [16, 8], strides = [1, 1]} : vector<16x192xbf16> to vector<16x8xbf16>
    %68 = vector.extract_strided_slice %11 {offsets = [0, 152], sizes = [16, 8], strides = [1, 1]} : vector<16x192xbf16> to vector<16x8xbf16>
    %69 = vector.extract_strided_slice %11 {offsets = [0, 184], sizes = [16, 8], strides = [1, 1]} : vector<16x192xbf16> to vector<16x8xbf16>
    %cst_24 = arith.constant dense<0.000000e+00> : vector<16x16xf32>
    %70 = tpu.matmul %67, %68, %cst_24 {dimension_numbers = #tpu.dot_dimension_numbers<[1], [1], [0], [0], [0, 0, 1, 0], [], []>} : vector<16x8xbf16>, vector<16x8xbf16>, vector<16x16xf32> -> vector<16x16xf32>
    %71 = arith.addf %70, %12 : vector<16x16xf32>
    %cst_25 = arith.constant dense<0xFF800000> : vector<16xf32>
    %72 = vector.multi_reduction <maximumf>, %71, %cst_25 [1] : vector<16x16xf32> to vector<16xf32>
    %73 = vector.shape_cast %72 : vector<16xf32> to vector<16x1xf32>
    %74 = vector.broadcast %73 : vector<16x1xf32> to vector<16x16xf32>
    %75 = arith.subf %71, %74 : vector<16x16xf32>
    %76 = math.exp %75 : vector<16x16xf32>
    %cst_26 = arith.constant dense<0.000000e+00> : vector<16xf32>
    %77 = vector.multi_reduction <add>, %76, %cst_26 [1] : vector<16x16xf32> to vector<16xf32>
    %78 = vector.shape_cast %77 : vector<16xf32> to vector<16x1xf32>
    %79 = tpu.reciprocal %78 {approx = true} : vector<16x1xf32> -> vector<16x1xf32>
    %80 = vector.broadcast %79 : vector<16x1xf32> to vector<16x16xf32>
    %81 = arith.mulf %76, %80 : vector<16x16xf32>
    %82 = arith.truncf %81 : vector<16x16xf32> to vector<16x16xbf16>
    %cst_27 = arith.constant dense<0.000000e+00> : vector<16x8xf32>
    %83 = tpu.matmul %82, %69, %cst_27 {dimension_numbers = #tpu.dot_dimension_numbers<[1], [0], [0], [1], [0, 0, 1, 1], [], []>} : vector<16x16xbf16>, vector<16x8xbf16>, vector<16x8xf32> -> vector<16x8xf32>
    %c0_28 = arith.constant 0 : index
    %c24_29 = arith.constant 24 : index
    %84 = vector.load %arg5[%c0_28, %c24_29] : memref<16x64xf32, #tpu.memory_space<vmem>>, vector<16x8xf32>
    tpu.vector_store %arg5[%c0_28, %c24_29], %83 {strides = array<i32>} : memref<16x64xf32, #tpu.memory_space<vmem>>, vector<16x8xf32>,
    %85 = vector.extract_strided_slice %10 {offsets = [0, 32], sizes = [16, 8], strides = [1, 1]} : vector<16x192xbf16> to vector<16x8xbf16>
    %86 = vector.extract_strided_slice %10 {offsets = [0, 64], sizes = [16, 8], strides = [1, 1]} : vector<16x192xbf16> to vector<16x8xbf16>
    %87 = vector.extract_strided_slice %10 {offsets = [0, 96], sizes = [16, 8], strides = [1, 1]} : vector<16x192xbf16> to vector<16x8xbf16>
    %cst_30 = arith.constant dense<0.000000e+00> : vector<16x16xf32>
    %88 = tpu.matmul %85, %86, %cst_30 {dimension_numbers = #tpu.dot_dimension_numbers<[1], [1], [0], [0], [0, 0, 1, 0], [], []>} : vector<16x8xbf16>, vector<16x8xbf16>, vector<16x16xf32> -> vector<16x16xf32>
    %89 = arith.addf %88, %12 : vector<16x16xf32>
    %cst_31 = arith.constant dense<0xFF800000> : vector<16xf32>
    %90 = vector.multi_reduction <maximumf>, %89, %cst_31 [1] : vector<16x16xf32> to vector<16xf32>
    %91 = vector.shape_cast %90 : vector<16xf32> to vector<16x1xf32>
    %92 = vector.broadcast %91 : vector<16x1xf32> to vector<16x16xf32>
    %93 = arith.subf %89, %92 : vector<16x16xf32>
    %94 = math.exp %93 : vector<16x16xf32>
    %cst_32 = arith.constant dense<0.000000e+00> : vector<16xf32>
    %95 = vector.multi_reduction <add>, %94, %cst_32 [1] : vector<16x16xf32> to vector<16xf32>
    %96 = vector.shape_cast %95 : vector<16xf32> to vector<16x1xf32>
    %97 = tpu.reciprocal %96 {approx = true} : vector<16x1xf32> -> vector<16x1xf32>
    %98 = vector.broadcast %97 : vector<16x1xf32> to vector<16x16xf32>
    %99 = arith.mulf %94, %98 : vector<16x16xf32>
    %100 = arith.truncf %99 : vector<16x16xf32> to vector<16x16xbf16>
    %cst_33 = arith.constant dense<0.000000e+00> : vector<16x8xf32>
    %101 = tpu.matmul %100, %87, %cst_33 {dimension_numbers = #tpu.dot_dimension_numbers<[1], [0], [0], [1], [0, 0, 1, 1], [], []>} : vector<16x16xbf16>, vector<16x8xbf16>, vector<16x8xf32> -> vector<16x8xf32>
    %c0_34 = arith.constant 0 : index
    %c32 = arith.constant 32 : index
    %102 = vector.load %arg5[%c0_34, %c32] : memref<16x64xf32, #tpu.memory_space<vmem>>, vector<16x8xf32>
    tpu.vector_store %arg5[%c0_34, %c32], %101 {strides = array<i32>} : memref<16x64xf32, #tpu.memory_space<vmem>>, vector<16x8xf32>,
    %103 = vector.extract_strided_slice %10 {offsets = [0, 40], sizes = [16, 8], strides = [1, 1]} : vector<16x192xbf16> to vector<16x8xbf16>
    %104 = vector.extract_strided_slice %10 {offsets = [0, 72], sizes = [16, 8], strides = [1, 1]} : vector<16x192xbf16> to vector<16x8xbf16>
    %105 = vector.extract_strided_slice %10 {offsets = [0, 104], sizes = [16, 8], strides = [1, 1]} : vector<16x192xbf16> to vector<16x8xbf16>
    %cst_35 = arith.constant dense<0.000000e+00> : vector<16x16xf32>
    %106 = tpu.matmul %103, %104, %cst_35 {dimension_numbers = #tpu.dot_dimension_numbers<[1], [1], [0], [0], [0, 0, 1, 0], [], []>} : vector<16x8xbf16>, vector<16x8xbf16>, vector<16x16xf32> -> vector<16x16xf32>
    %107 = arith.addf %106, %12 : vector<16x16xf32>
    %cst_36 = arith.constant dense<0xFF800000> : vector<16xf32>
    %108 = vector.multi_reduction <maximumf>, %107, %cst_36 [1] : vector<16x16xf32> to vector<16xf32>
    %109 = vector.shape_cast %108 : vector<16xf32> to vector<16x1xf32>
    %110 = vector.broadcast %109 : vector<16x1xf32> to vector<16x16xf32>
    %111 = arith.subf %107, %110 : vector<16x16xf32>
    %112 = math.exp %111 : vector<16x16xf32>
    %cst_37 = arith.constant dense<0.000000e+00> : vector<16xf32>
    %113 = vector.multi_reduction <add>, %112, %cst_37 [1] : vector<16x16xf32> to vector<16xf32>
    %114 = vector.shape_cast %113 : vector<16xf32> to vector<16x1xf32>
    %115 = tpu.reciprocal %114 {approx = true} : vector<16x1xf32> -> vector<16x1xf32>
    %116 = vector.broadcast %115 : vector<16x1xf32> to vector<16x16xf32>
    %117 = arith.mulf %112, %116 : vector<16x16xf32>
    %118 = arith.truncf %117 : vector<16x16xf32> to vector<16x16xbf16>
    %cst_38 = arith.constant dense<0.000000e+00> : vector<16x8xf32>
    %119 = tpu.matmul %118, %105, %cst_38 {dimension_numbers = #tpu.dot_dimension_numbers<[1], [0], [0], [1], [0, 0, 1, 1], [], []>} : vector<16x16xbf16>, vector<16x8xbf16>, vector<16x8xf32> -> vector<16x8xf32>
    %c0_39 = arith.constant 0 : index
    %c40 = arith.constant 40 : index
    %120 = vector.load %arg5[%c0_39, %c40] : memref<16x64xf32, #tpu.memory_space<vmem>>, vector<16x8xf32>
    tpu.vector_store %arg5[%c0_39, %c40], %119 {strides = array<i32>} : memref<16x64xf32, #tpu.memory_space<vmem>>, vector<16x8xf32>,
    %121 = vector.extract_strided_slice %10 {offsets = [0, 48], sizes = [16, 8], strides = [1, 1]} : vector<16x192xbf16> to vector<16x8xbf16>
    %122 = vector.extract_strided_slice %10 {offsets = [0, 80], sizes = [16, 8], strides = [1, 1]} : vector<16x192xbf16> to vector<16x8xbf16>
    %123 = vector.extract_strided_slice %10 {offsets = [0, 112], sizes = [16, 8], strides = [1, 1]} : vector<16x192xbf16> to vector<16x8xbf16>
    %cst_40 = arith.constant dense<0.000000e+00> : vector<16x16xf32>
    %124 = tpu.matmul %121, %122, %cst_40 {dimension_numbers = #tpu.dot_dimension_numbers<[1], [1], [0], [0], [0, 0, 1, 0], [], []>} : vector<16x8xbf16>, vector<16x8xbf16>, vector<16x16xf32> -> vector<16x16xf32>
    %125 = arith.addf %124, %12 : vector<16x16xf32>
    %cst_41 = arith.constant dense<0xFF800000> : vector<16xf32>
    %126 = vector.multi_reduction <maximumf>, %125, %cst_41 [1] : vector<16x16xf32> to vector<16xf32>
    %127 = vector.shape_cast %126 : vector<16xf32> to vector<16x1xf32>
    %128 = vector.broadcast %127 : vector<16x1xf32> to vector<16x16xf32>
    %129 = arith.subf %125, %128 : vector<16x16xf32>
    %130 = math.exp %129 : vector<16x16xf32>
    %cst_42 = arith.constant dense<0.000000e+00> : vector<16xf32>
    %131 = vector.multi_reduction <add>, %130, %cst_42 [1] : vector<16x16xf32> to vector<16xf32>
    %132 = vector.shape_cast %131 : vector<16xf32> to vector<16x1xf32>
    %133 = tpu.reciprocal %132 {approx = true} : vector<16x1xf32> -> vector<16x1xf32>
    %134 = vector.broadcast %133 : vector<16x1xf32> to vector<16x16xf32>
    %135 = arith.mulf %130, %134 : vector<16x16xf32>
    %136 = arith.truncf %135 : vector<16x16xf32> to vector<16x16xbf16>
    %cst_43 = arith.constant dense<0.000000e+00> : vector<16x8xf32>
    %137 = tpu.matmul %136, %123, %cst_43 {dimension_numbers = #tpu.dot_dimension_numbers<[1], [0], [0], [1], [0, 0, 1, 1], [], []>} : vector<16x16xbf16>, vector<16x8xbf16>, vector<16x8xf32> -> vector<16x8xf32>
    %c0_44 = arith.constant 0 : index
    %c48 = arith.constant 48 : index
    %138 = vector.load %arg5[%c0_44, %c48] : memref<16x64xf32, #tpu.memory_space<vmem>>, vector<16x8xf32>
    tpu.vector_store %arg5[%c0_44, %c48], %137 {strides = array<i32>} : memref<16x64xf32, #tpu.memory_space<vmem>>, vector<16x8xf32>,
    %139 = vector.extract_strided_slice %10 {offsets = [0, 56], sizes = [16, 8], strides = [1, 1]} : vector<16x192xbf16> to vector<16x8xbf16>
    %140 = vector.extract_strided_slice %10 {offsets = [0, 88], sizes = [16, 8], strides = [1, 1]} : vector<16x192xbf16> to vector<16x8xbf16>
    %141 = vector.extract_strided_slice %10 {offsets = [0, 120], sizes = [16, 8], strides = [1, 1]} : vector<16x192xbf16> to vector<16x8xbf16>
    %cst_45 = arith.constant dense<0.000000e+00> : vector<16x16xf32>
    %142 = tpu.matmul %139, %140, %cst_45 {dimension_numbers = #tpu.dot_dimension_numbers<[1], [1], [0], [0], [0, 0, 1, 0], [], []>} : vector<16x8xbf16>, vector<16x8xbf16>, vector<16x16xf32> -> vector<16x16xf32>
    %143 = arith.addf %142, %12 : vector<16x16xf32>
    %cst_46 = arith.constant dense<0xFF800000> : vector<16xf32>
    %144 = vector.multi_reduction <maximumf>, %143, %cst_46 [1] : vector<16x16xf32> to vector<16xf32>
    %145 = vector.shape_cast %144 : vector<16xf32> to vector<16x1xf32>
    %146 = vector.broadcast %145 : vector<16x1xf32> to vector<16x16xf32>
    %147 = arith.subf %143, %146 : vector<16x16xf32>
    %148 = math.exp %147 : vector<16x16xf32>
    %cst_47 = arith.constant dense<0.000000e+00> : vector<16xf32>
    %149 = vector.multi_reduction <add>, %148, %cst_47 [1] : vector<16x16xf32> to vector<16xf32>
    %150 = vector.shape_cast %149 : vector<16xf32> to vector<16x1xf32>
    %151 = tpu.reciprocal %150 {approx = true} : vector<16x1xf32> -> vector<16x1xf32>
    %152 = vector.broadcast %151 : vector<16x1xf32> to vector<16x16xf32>
    %153 = arith.mulf %148, %152 : vector<16x16xf32>
    %154 = arith.truncf %153 : vector<16x16xf32> to vector<16x16xbf16>
    %cst_48 = arith.constant dense<0.000000e+00> : vector<16x8xf32>
    %155 = tpu.matmul %154, %141, %cst_48 {dimension_numbers = #tpu.dot_dimension_numbers<[1], [0], [0], [1], [0, 0, 1, 1], [], []>} : vector<16x16xbf16>, vector<16x8xbf16>, vector<16x8xf32> -> vector<16x8xf32>
    %c0_49 = arith.constant 0 : index
    %c56 = arith.constant 56 : index
    %156 = vector.load %arg5[%c0_49, %c56] : memref<16x64xf32, #tpu.memory_space<vmem>>, vector<16x8xf32>
    tpu.vector_store %arg5[%c0_49, %c56], %155 {strides = array<i32>} : memref<16x64xf32, #tpu.memory_space<vmem>>, vector<16x8xf32>,
    %c0_50 = arith.constant 0 : index
    %c0_51 = arith.constant 0 : index
    %157 = vector.load %arg5[%c0_50, %c0_51] : memref<16x64xf32, #tpu.memory_space<vmem>>, vector<16x64xf32>
    %158 = arith.truncf %157 : vector<16x64xf32> to vector<16x64xbf16>
    %c32_52 = arith.constant 32 : index
    %c0_53 = arith.constant 0 : index
    %159 = vector.load %arg2[%c32_52, %c0_53] : memref<192x256xbf16, #tpu.memory_space<vmem>>, vector<64x64xbf16>
    %cst_54 = arith.constant dense<0.000000e+00> : vector<16x64xf32>
    %160 = tpu.matmul %158, %159, %cst_54 {dimension_numbers = #tpu.dot_dimension_numbers<[1], [0], [0], [1], [0, 0, 1, 1], [], []>} : vector<16x64xbf16>, vector<64x64xbf16>, vector<16x64xf32> -> vector<16x64xf32>
    %c1 = arith.constant 1 : index
    %c0_55 = arith.constant 0 : index
    %161 = vector.load %arg3[%c1, %c0_55] : memref<40x256xf32, #tpu.memory_space<vmem>>, vector<1x64xf32>
    %162 = vector.broadcast %161 : vector<1x64xf32> to vector<16x64xf32>
    %163 = arith.addf %160, %162 : vector<16x64xf32>
    %164 = arith.truncf %163 : vector<16x64xf32> to vector<16x64xbf16>
    %c96 = arith.constant 96 : index
    %c0_56 = arith.constant 0 : index
    %165 = vector.load %arg2[%c96, %c0_56] : memref<192x256xbf16, #tpu.memory_space<vmem>>, vector<64x32xbf16>
    %cst_57 = arith.constant dense<0.000000e+00> : vector<16x32xf32>
    %166 = tpu.matmul %164, %165, %cst_57 {dimension_numbers = #tpu.dot_dimension_numbers<[1], [0], [0], [1], [0, 0, 1, 1], [], []>} : vector<16x64xbf16>, vector<64x32xbf16>, vector<16x32xf32> -> vector<16x32xf32>
    %c2 = arith.constant 2 : index
    %c0_58 = arith.constant 0 : index
    %167 = vector.load %arg3[%c2, %c0_58] : memref<40x256xf32, #tpu.memory_space<vmem>>, vector<1x32xf32>
    %168 = vector.broadcast %167 : vector<1x32xf32> to vector<16x32xf32>
    %169 = arith.addf %166, %168 : vector<16x32xf32>
    %cst_59 = arith.constant 0.000000e+00 : f32
    %170 = vector.broadcast %cst_59 : f32 to vector<16x32xf32>
    %171 = arith.maximumf %169, %170 : vector<16x32xf32>
    %172 = arith.truncf %171 : vector<16x32xf32> to vector<16x32xbf16>
    %c160 = arith.constant 160 : index
    %c0_60 = arith.constant 0 : index
    %173 = vector.load %arg2[%c160, %c0_60] : memref<192x256xbf16, #tpu.memory_space<vmem>>, vector<32x2xbf16>
    %cst_61 = arith.constant dense<0.000000e+00> : vector<16x2xf32>
    %174 = tpu.matmul %172, %173, %cst_61 {dimension_numbers = #tpu.dot_dimension_numbers<[1], [0], [0], [1], [0, 0, 1, 1], [], []>} : vector<16x32xbf16>, vector<32x2xbf16>, vector<16x2xf32> -> vector<16x2xf32>
    %c8_62 = arith.constant 8 : index
    %c0_63 = arith.constant 0 : index
    %175 = vector.load %arg3[%c8_62, %c0_63] : memref<40x256xf32, #tpu.memory_space<vmem>>, vector<16x6xf32>
    %176 = vector.extract_strided_slice %174 {offsets = [0, 0], sizes = [16, 1], strides = [1, 1]} : vector<16x2xf32> to vector<16x1xf32>
    %177 = vector.extract_strided_slice %175 {offsets = [0, 0], sizes = [16, 3], strides = [1, 1]} : vector<16x6xf32> to vector<16x3xf32>
    %178 = vector.broadcast %176 : vector<16x1xf32> to vector<16x3xf32>
    %179 = arith.mulf %178, %177 : vector<16x3xf32>
    %180 = vector.extract_strided_slice %174 {offsets = [0, 1], sizes = [16, 1], strides = [1, 1]} : vector<16x2xf32> to vector<16x1xf32>
    %181 = vector.extract_strided_slice %175 {offsets = [0, 3], sizes = [16, 3], strides = [1, 1]} : vector<16x6xf32> to vector<16x3xf32>
    %182 = vector.broadcast %180 : vector<16x1xf32> to vector<16x3xf32>
    %183 = arith.mulf %182, %181 : vector<16x3xf32>
    %184 = arith.addf %179, %183 : vector<16x3xf32>
    %c4 = arith.constant 4 : index
    %c0_64 = arith.constant 0 : index
    %185 = vector.load %arg3[%c4, %c0_64] : memref<40x256xf32, #tpu.memory_space<vmem>>, vector<2x16xf32>
    %cst_65 = arith.constant dense<0.000000e+00> : vector<2x3xf32>
    %186 = tpu.matmul %185, %184, %cst_65 {dimension_numbers = #tpu.dot_dimension_numbers<[1], [0], [0], [1], [0, 0, 1, 1], [], []>} : vector<2x16xf32>, vector<16x3xf32>, vector<2x3xf32> -> vector<2x3xf32>
    %c3 = arith.constant 3 : index
    %c0_66 = arith.constant 0 : index
    %187 = vector.load %arg3[%c3, %c0_66] : memref<40x256xf32, #tpu.memory_space<vmem>>, vector<1x3xf32>
    %188 = vector.broadcast %187 : vector<1x3xf32> to vector<2x3xf32>
    %189 = arith.addf %186, %188 : vector<2x3xf32>
    %c0_67 = arith.constant 0 : index
    %c0_68 = arith.constant 0 : index
    %190 = vector.load %arg4[%c0_67, %c0_68] : memref<2x3xf32, #tpu.memory_space<vmem>>, vector<2x3xf32>
    tpu.vector_store %arg4[%c0_67, %c0_68], %189 {strides = array<i32>} : memref<2x3xf32, #tpu.memory_space<vmem>>, vector<2x3xf32>,
    return
  }
}

</mosaic_0001>

<bundles_post_ra>
// kernel: alm_bert_head.1
= control target key start
LH: loop header
LB: loop body
LE: loop exit
PB: predicated region body
PF: predicated region fallthrough
CT: control target
= control target key end

     0   :  { %9 = vsyncpa [#allocation4], 0  ;;  %s2490_s0 = inlined_call_operand.hbm [shape: f32[16,32], index: 0, kind: input, shape index: {}]   ;;  %s2491_s1 = inlined_call_operand.hbm [shape: f32[16,32], index: 1, kind: input, shape index: {}]   ;;  %s2492_s2 = inlined_call_operand.hbm [shape: bf16[192,256], index: 2, kind: input, shape index: {}]   ;;  %s2493_s3 = inlined_call_operand.hbm [shape: f32[40,256], index: 3, kind: input, shape index: {}]   ;;  %s2494_s4 = inlined_call_operand.hbm [shape: f32[2,3], index: 4, kind: output, shape index: {}]  }
   0x1   :  { %10 = vsyncpa [#allocation7], 0 }
   0x2   :  { %11 = vsyncpa [#allocation10], 0 }
   0x3   :  { %12 = vsyncpa [#allocation5], 0  ;;  %s2025_s15 = smov [#allocation6]   ;;  %s2026_s17 = smov [#allocation3]  }
   0x4   :  { %s30_s16 = sshll.u32 %s2025_s15, 4  ;;  %s18_s18 = sshll.u32 %s2026_s17, 4  ;;  %s31_s16 = int_to_ptr.vmem [resolvable:$true] %s30_s16  ;;  %s2078_s18 = int_to_ptr.vmem [resolvable:$true] %s18_s18 }
   0x5   :  { %s1907_s21 = scalar_lea.hbm %s2491_s1, 256 }
   0x6   :  { %p1908_p0 = scmp.ne.s32.totalorder %s2491_s1, %s1907_s21  ;;  %p1911_p1 = scmp.lt.u32.totalorder %s1907_s21, %s2491_s1 }
   0x8   :  { %p1913_p2 = pnand %p1911_p1, %p1908_p0 }
   0xa   :  { %1916 = shalt.err (!%p1913_p2)
}
   0xb   :  { %s1917_s26 = scalar_lea.vmem %s31_s16, 256  ;;  %p1922_p4 = scmp.lt.s32.totalorder %s31_s16, %s31_s16 }
   0xc   :  { %p1918_p3 = scmp.ne.s32.totalorder %s31_s16, %s1917_s26  ;;  %p1923_p5 = scmp.lt.s32.totalorder %s1917_s26, %s1917_s26 }
   0xe   :  { %p1924_p6 = por %p1923_p5, %p1922_p4 }
  0x10   :  { %p1925_p7 = pnand %p1924_p6, %p1918_p3 }
  0x12   :  { %1928 = shalt.err (!%p1925_p7)
}
  0x13   :  { %s2027_s27 = smov 128   ;;  %s2028_s28 = smov 8  }
  0x14   :  { %36 = dma.hbm_to_vmem [thread:$0]  %s2491_s1, 256, %s31_s16, [#allocation7], %s2027_s27, %s2027_s27, %s2028_s28  }
  0x15   :  { %s1929_s7 = scalar_lea.hbm %s2490_s0, 256 }
  0x16   :  { %p1930_p8 = scmp.ne.s32.totalorder %s2490_s0, %s1929_s7  ;;  %p1933_p9 = scmp.lt.u32.totalorder %s1929_s7, %s2490_s0 }
  0x18   :  { %p1935_p10 = pnand %p1933_p9, %p1930_p8 }
  0x1a   :  { %1938 = shalt.err (!%p1935_p10)
}
  0x1b   :  { %s1939_s12 = scalar_lea.vmem %s2078_s18, 256  ;;  %p1944_p12 = scmp.lt.s32.totalorder %s2078_s18, %s2078_s18 }
  0x1c   :  { %p1940_p11 = scmp.ne.s32.totalorder %s2078_s18, %s1939_s12  ;;  %p1945_p13 = scmp.lt.s32.totalorder %s1939_s12, %s1939_s12 }
  0x1e   :  { %p1946_p0 = por %p1945_p13, %p1944_p12 }
  0x20   :  { %p1947_p1 = pnand %p1946_p0, %p1940_p11 }
  0x22   :  { %1950 = shalt.err (!%p1947_p1)
}
  0x23   :  { %24 = dma.hbm_to_vmem [thread:$0]  %s2490_s0, 256, %s2078_s18, [#allocation4], %s2027_s27, %s2027_s27, %s2028_s28  }
  0x24   :  { %s2029_s14 = smov [#allocation8]   ;;  %s2030_s16 = smov [#allocation9]  }
  0x25   :  { %s42_s15 = sshll.u32 %s2029_s14, 4  ;;  %s54_s17 = sshll.u32 %s2030_s16, 4  ;;  %s43_s15 = int_to_ptr.vmem [resolvable:$true] %s42_s15  ;;  %s2115_s17 = int_to_ptr.vmem [resolvable:$true] %s54_s17 }
  0x26   :  { %s1951_s21 = scalar_lea.hbm %s2492_s2, 3072 }
  0x27   :  { %p1952_p2 = scmp.ne.s32.totalorder %s2492_s2, %s1951_s21  ;;  %p1955_p3 = scmp.lt.u32.totalorder %s1951_s21, %s2492_s2 }
  0x29   :  { %p1957_p4 = pnand %p1955_p3, %p1952_p2 }
  0x2b   :  { %1960 = shalt.err (!%p1957_p4)
}
  0x2c   :  { %s1961_s0 = scalar_lea.vmem %s43_s15, 3072  ;;  %p1966_p6 = scmp.lt.s32.totalorder %s43_s15, %s43_s15 }
  0x2d   :  { %p1962_p5 = scmp.ne.s32.totalorder %s43_s15, %s1961_s0  ;;  %p1967_p7 = scmp.lt.s32.totalorder %s1961_s0, %s1961_s0 }
  0x2f   :  { %p1968_p8 = por %p1967_p7, %p1966_p6 }
  0x31   :  { %p1969_p9 = pnand %p1968_p8, %p1962_p5 }
  0x33   :  { %1972 = shalt.err (!%p1969_p9)
}
  0x34   :  { %48 = dma.hbm_to_vmem [thread:$0]  %s2492_s2, 3072, %s43_s15, [#allocation7], %s2027_s27, %s2027_s27, %s2028_s28  }
  0x35   :  { %s1973_s5 = scalar_lea.hbm %s2493_s3, 1280 }
  0x36   :  { %p1974_p10 = scmp.ne.s32.totalorder %s2493_s3, %s1973_s5  ;;  %p1977_p11 = scmp.lt.u32.totalorder %s1973_s5, %s2493_s3 }
  0x38   :  { %p1979_p12 = pnand %p1977_p11, %p1974_p10 }
  0x3a   :  { %1982 = shalt.err (!%p1979_p12)
}
  0x3b   :  { %s1983_s10 = scalar_lea.vmem %s2115_s17, 1280  ;;  %p1988_p0 = scmp.lt.s32.totalorder %s2115_s17, %s2115_s17 }
  0x3c   :  { %p1984_p13 = scmp.ne.s32.totalorder %s2115_s17, %s1983_s10  ;;  %p1989_p1 = scmp.lt.s32.totalorder %s1983_s10, %s1983_s10 }
  0x3e   :  { %p1990_p2 = por %p1989_p1, %p1988_p0 }
  0x40   :  { %p1991_p3 = pnand %p1990_p2, %p1984_p13 }
  0x42   :  { %1994 = shalt.err (!%p1991_p3)
}
  0x43   :  { %s2031_s2 = smov 256   ;;  %s2032_s27 = smov 16  }
  0x44   :  { %60 = dma.hbm_to_vmem [thread:$0]  %s2493_s3, 1280, %s2115_s17, [#allocation10], %s2031_s2, %s2031_s2, %s2032_s27  }
  0x45   :  { %2017 = dma.done.wait [#allocation4], 256  }
  0x46   :  { %2018 = vsyncadd [#allocation4], 4294967040 }
  0x47   :  { %2019 = dma.done.wait [#allocation7], 3328  }
  0x48   :  { %2020 = vsyncadd [#allocation7], 4294963968 }
  0x49   :  { %2021 = dma.done.wait [#allocation10], 1280  }
  0x4a   :  { %2022 = vsyncadd [#allocation10], 4294966016  ;;  %v2033_v0 = vmov 0   ;;  %v1827_v1 = vld [vmem:[#allocation8 + $0x4] ss:$8 sps:$4 sm:$0xff]   ;;  %vm116_vm0 = vcmask 261120   ;;  %v86_v12 = vlaneseq }
  0x4b   :  { %155 = vmatprep.mubr.bf16.mxu0 %v2033_v0  ;;  %v1829_v2 = vld [vmem:[#allocation8] ss:$8 sps:$4 sm:$0xff]   ;;  %123 = vmatprep.subr.bf16.mxu0 %v1827_v1  ;;  %v1830_v3 = vld [vmem:[#allocation8 + $0x14] ss:$8 sps:$4 sm:$0xff]   ;;  %v1832_v4 = vld [vmem:[#allocation8 + $0x10] ss:$8 sps:$4 sm:$0xff]  }
  0x4c   :  { %124 = vmatpush1.bf16.msra.mxu0 %v1829_v2  ;;  %v74_v5 = vld [vmem:[#allocation3] sm:$0xff]  ;;  %v75_v6 = vld [vmem:[#allocation3 + $0x8] sm:$0xff]  ;;  %v76_v8 = vld [vmem:[#allocation6] sm:$0xff]  ;;  %v2034_v11 = vmov 0.0   ;;  %vm2035_vm1 = vmmov 0   ;;  %v87_v13 = vshrl.u32 %v86_v12, 7 }
  0x4d   :  { %125 = vmatprep.subr.bf16.mxu0 %v1830_v3  ;;  %v78_v7 = vpack.c.bf16 %v75_v6, %v74_v5  ;;  %v77_v9 = vld [vmem:[#allocation6 + $0x8] sm:$0xff]  ;;  %1658 = vmatprep.subr.bf16.mxu1 %v2034_v11  ;;  %v84_v15 = vld [vmem:[#allocation9] ss:$8 sm:$0x3]  ;;  %vm176_vm2 = vcmask 64512   ;;  %s2036_s3 = smov 112  }
  0x4e   :  { %v79_v10 = vpack.c.bf16 %v77_v9, %v76_v8  ;;  %1660 = vmatprep.mubr.msk.bf16.mxu1 %vm2035_vm1, %v2034_v11  ;;  %v88_v14 = vsub.s32 0, %v87_v13  ;;  %v92_v23 = vsub.s32 1, %v87_v13  ;;  %s2037_s1 = smov 120   ;;  %s2038_s13 = smov 104   ;;  %v2228_v56 = vld [vmem:[#allocation9 + $0x30] sm:$0xff]  ;;  %v2230_v58 = vld [vmem:[#allocation9 + $0x40] sm:$0xff] }
  0x4f   :  { %s2039_s14 = smov 96   ;;  %s2040_s15 = smov 64   ;;  %vm224_vm3 = vcmask 130048   ;;  %vm428_vm4 = vcmask 130112   ;;  %vm560_vm5 = vcmask 195712   ;;  %vm692_vm6 = vcmask 261312  }
  0x50   :  { %126 = vmatpush1.bf16.msra.mxu0 %v1832_v4  ;;  %v89_v16 = vrot.slane %v84_v15, %v88_v14  ;;  %v93_v26 = vrot.slane %v84_v15, %v92_v23  ;;  %s2041_s16 = smov 88   ;;  %s2042_s17 = smov 56   ;;  %vm824_vm7 = vcmask 326912   ;;  %vm956_vm8 = vcmask 392512  }
  0x51   :  { %1670 = vmatprep.subr.bf16.mxu0 %v2034_v11  ;;  %s2043_s19 = smov 80   ;;  %s2044_s20 = smov 48   ;;  %vm1088_vm9 = vcmask 458112   ;;  %vm1220_vm10 = vcmask 523712   ;;  %vm1259_vm11 = vcmask 523264   ;;  %vm1555_vm12 = vcmask 17408  }
  0x52   :  { %s2045_s21 = smov 72   ;;  %s2046_s22 = smov 40  }
  0x53   :  { %1578 = vmatmul.mubr.msk.bf16.vlgmr.msra.gmra.mrb[0].mxu0 %vm116_vm0, %v78_v7  ;;  %s2047_s23 = smov 32   ;;  %s2048_s24 = smov 24  }
  0x54   :  { %163 = vmatprep.mubr.bf16.mxu0 %v2033_v0  ;;  %s2052_s25 = smov [#allocation11]  }
  0x55   :  { %s1563_s0 = sshll.u32 %s2052_s25, 4  ;;  %s1564_s0 = int_to_ptr.vmem [resolvable:$true] %s1563_s0 }
  0x56   :  { %s1995_s18 = scalar_lea.vmem %s1564_s0, 32  ;;  %p2000_p5 = scmp.lt.s32.totalorder %s1564_s0, %s1564_s0 }
  0x57   :  { %p1996_p4 = scmp.ne.s32.totalorder %s1564_s0, %s1995_s18  ;;  %p2001_p6 = scmp.lt.s32.totalorder %s1995_s18, %s1995_s18 }
  0x59   :  { %p2002_p7 = por %p2001_p6, %p2000_p5 }
  0x5b   :  { %1579 = vmatmul.mubr.msk.bf16.gmra.mrb[4].mxu0 %vm116_vm0, %v79_v10  ;;  %p2003_p8 = pnand %p2002_p7, %p1996_p4 }
  0x5c   :  { %1672 = vmatprep.mubr.msk.bf16.mxu0 %vm2035_vm1, %v2034_v11 }
 0x126   :  { %v157_v17 = vpop.f32.mrb[0].mxu0 }
 0x127   :  { %v159_v18 = vpop.f32.mrb[1].mxu0  ;;  %v158_v20 = vadd.f32 %v157_v17, %v89_v16 }
 0x128   :  { %v160_v19 = vpop.f32.mrb[2].mxu0 }
 0x129   :  { %v161_v21 = vadd.f32 %v160_v19, %v89_v16  ;;  %v162_v22 = vpop.f32.mrb[3].mxu0 }
 0x12b   :  { %v2160_v24 = vpack.c.bf16 %v161_v21, %v158_v20 }
 0x12e   :  { %v165_v25 = vpop.f32.mrb[4].mxu0 }
 0x12f   :  { %v166_v27 = vpop.f32.mrb[5].mxu0 }
 0x130   :  { %v168_v28 = vpop.f32.mrb[6].mxu0  ;;  %v167_v30 = vadd.f32 %v166_v27, %v93_v26 }
 0x131   :  { %v169_v29 = vpop.f32.mrb[7].mxu0 }
 0x132   :  { %v170_v31 = vadd.f32 %v169_v29, %v93_v26 }
 0x134   :  { %v2162_v32 = vpack.c.bf16 %v170_v31, %v167_v30 }
 0x136   :  { %433 = vrot.lane.b32.xlu1 %v2162_v32, %s2036_s3  ;;  %301 = vrot.lane.b32.xlu0 %v2162_v32, %s2037_s1  ;;  %v181_v33 = vsel %vm176_vm2, %v2162_v32, 0 }
 0x137   :  { %1659 = vmatpush3.bf16.xpose.msra.mxu1 %v181_v33 }
 0x138   :  { %1664 = vmatprep.subr.bf16.mxu1 %v2034_v11 }
 0x13a   :  { %431 = vrot.lane.b32.xlu1 %v2160_v24, %s2036_s3  ;;  %299 = vrot.lane.b32.xlu0 %v2160_v24, %s2037_s1 }
 0x13e   :  { %563 = vrot.lane.b32.xlu1 %v2160_v24, %s2038_s13  ;;  %565 = vrot.lane.b32.xlu0 %v2162_v32, %s2038_s13 }
 0x13f   :  { %1661 = vmatmul.mubr.msk.bf16.vlgmr.msra.gmra.mrb[0].mxu1 %vm176_vm2, %v2160_v24 }
 0x140   :  { %1666 = vmatprep.mubr.msk.bf16.mxu1 %vm2035_vm1, %v2034_v11 }
 0x142   :  { %695 = vrot.lane.b32.xlu1 %v2160_v24, %s2039_s14  ;;  %697 = vrot.lane.b32.xlu0 %v2160_v24, %s2040_s15 }
 0x146   :  { %827 = vrot.lane.b32.xlu1 %v2160_v24, %s2041_s16  ;;  %829 = vrot.lane.b32.xlu0 %v2160_v24, %s2042_s17 }
 0x14a   :  { %959 = vrot.lane.b32.xlu1 %v2160_v24, %s2043_s19  ;;  %961 = vrot.lane.b32.xlu0 %v2160_v24, %s2044_s20 }
 0x14e   :  { %1091 = vrot.lane.b32.xlu1 %v2160_v24, %s2045_s21  ;;  %1093 = vrot.lane.b32.xlu0 %v2160_v24, %s2046_s22 }
 0x152   :  { %249 = vrot.lane.b32.xlu1 %v2162_v32, %s2039_s14 }
 0x1a8   :  { %v434_v34 = vpop.permute.xlu1 %433  ;;  %v302_v35 = vpop.permute.xlu0 %301 }
 0x1a9   :  { %v307_v36 = vsel %vm176_vm2, %v302_v35, 0  ;;  %v439_v40 = vsel %vm176_vm2, %v434_v34, 0 }
 0x1aa   :  { %1671 = vmatpush3.bf16.xpose.msra.mxu0 %v307_v36 }
 0x1ab   :  { %1682 = vmatprep.subr.bf16.mxu0 %v2034_v11 }
 0x1ac   :  { %v432_v37 = vpop.permute.xlu1 %431  ;;  %v300_v38 = vpop.permute.xlu0 %299 }
 0x1b0   :  { %v564_v39 = vpop.permute.xlu1 %563  ;;  %v566_v42 = vpop.permute.xlu0 %565 }
 0x1b1   :  { %1673 = vmatmul.mubr.msk.bf16.vlgmr.msra.gmra.mrb[8].mxu0 %vm176_vm2, %v300_v38  ;;  %v571_v44 = vsel %vm176_vm2, %v566_v42, 0 }
 0x1b2   :  { %1683 = vmatpush3.bf16.xpose.msra.mxu0 %v439_v40  ;;  %1684 = vmatprep.mubr.msk.bf16.mxu0 %vm2035_vm1, %v2034_v11 }
 0x1b3   :  { %1694 = vmatprep.subr.bf16.mxu0 %v2034_v11 }
 0x1b4   :  { %v696_v41 = vpop.permute.xlu1 %695  ;;  %v698_v46 = vpop.permute.xlu0 %697 }
 0x1b5   :  { %v703_v48 = vsel %vm176_vm2, %v698_v46, 0 }
 0x1b8   :  { %v828_v43 = vpop.permute.xlu1 %827  ;;  %v830_v50 = vpop.permute.xlu0 %829 }
 0x1b9   :  { %1685 = vmatmul.mubr.msk.bf16.vlgmr.msra.gmra.mrb[12].mxu0 %vm176_vm2, %v432_v37  ;;  %v835_v51 = vsel %vm176_vm2, %v830_v50, 0 }
 0x1ba   :  { %1695 = vmatpush3.bf16.xpose.msra.mxu0 %v571_v44  ;;  %1696 = vmatprep.mubr.msk.bf16.mxu0 %vm2035_vm1, %v2034_v11 }
 0x1bb   :  { %1706 = vmatprep.subr.bf16.mxu0 %v2034_v11 }
 0x1bc   :  { %v960_v45 = vpop.permute.xlu1 %959  ;;  %v962_v52 = vpop.permute.xlu0 %961 }
 0x1bd   :  { %v967_v53 = vsel %vm176_vm2, %v962_v52, 0 }
 0x1c0   :  { %v1092_v47 = vpop.permute.xlu1 %1091  ;;  %v1094_v54 = vpop.permute.xlu0 %1093 }
 0x1c1   :  { %1697 = vmatmul.mubr.msk.bf16.vlgmr.msra.gmra.mrb[16].mxu0 %vm176_vm2, %v564_v39  ;;  %v1099_v55 = vsel %vm176_vm2, %v1094_v54, 0 }
 0x1c2   :  { %1707 = vmatpush3.bf16.xpose.msra.mxu0 %v703_v48  ;;  %1708 = vmatprep.mubr.msk.bf16.mxu0 %vm2035_vm1, %v2034_v11 }
 0x1c3   :  { %1718 = vmatprep.subr.bf16.mxu0 %v2034_v11 }
 0x1c4   :  { %v250_v49 = vpop.permute.xlu1 %249 }
 0x1c5   :  { %1665 = vmatpush3.bf16.msra.mxu1 %v250_v49 }
 0x1c6   :  { %1676 = vmatprep.subr.bf16.mxu1 %v2034_v11 }
 0x1c9   :  { %1709 = vmatmul.mubr.msk.bf16.vlgmr.msra.gmra.mrb[20].mxu0 %vm176_vm2, %v696_v41 }
 0x1ca   :  { %1719 = vmatpush3.bf16.xpose.msra.mxu0 %v835_v51  ;;  %1720 = vmatprep.mubr.msk.bf16.mxu0 %vm2035_vm1, %v2034_v11 }
 0x1cb   :  { %1730 = vmatprep.subr.bf16.mxu0 %v2034_v11 }
 0x1d1   :  { %1721 = vmatmul.mubr.msk.bf16.vlgmr.msra.gmra.mrb[24].mxu0 %vm176_vm2, %v828_v43 }
 0x1d2   :  { %1731 = vmatpush3.bf16.xpose.msra.mxu0 %v967_v53  ;;  %1732 = vmatprep.mubr.msk.bf16.mxu0 %vm2035_vm1, %v2034_v11 }
 0x1d3   :  { %1742 = vmatprep.subr.bf16.mxu0 %v2034_v11 }
 0x1d9   :  { %1733 = vmatmul.mubr.msk.bf16.vlgmr.msra.gmra.mrb[28].mxu0 %vm176_vm2, %v960_v45 }
 0x1da   :  { %1743 = vmatpush3.bf16.xpose.msra.mxu0 %v1099_v55  ;;  %1744 = vmatprep.mubr.msk.bf16.mxu0 %vm2035_vm1, %v2034_v11 }
 0x1db   :  { %1754 = vmatprep.subr.bf16.mxu0 %v2034_v11 }
 0x1e1   :  { %1745 = vmatmul.mubr.msk.bf16.vlgmr.msra.gmra.mrb[32].mxu0 %vm176_vm2, %v1092_v47 }
 0x1e2   :  { %1762 = vmatprep.mubr.msk.bf16.mxu0 %vm2035_vm1, %v2034_v11 }
 0x212   :  { %v217_v57 = vpop.f32.mrb[0].mxu1 }
 0x213   :  { %v218_v59 = vadd.f32 %v217_v57, %v2228_v56  ;;  %v1662_v60 = vpop.f32.mrb[1].mxu1 }
 0x214   :  { %v220_v61 = vpop.f32.mrb[2].mxu1 }
 0x215   :  { %v221_v62 = vadd.f32 %v220_v61, %v2230_v58  ;;  %v1663_v63 = vpop.f32.mrb[3].mxu1  ;;  %v225_v1 = vsel %vm224_vm3, %v218_v59, -inf }
 0x216   :  { %226 = vmax.xlane.f32.xlu0 %v225_v1 }
 0x217   :  { %v228_v2 = vsel %vm224_vm3, %v221_v62, -inf }
 0x218   :  { %229 = vmax.xlane.f32.xlu1 %v228_v2 }
 0x284   :  { %v343_v3 = vpop.f32.mrb[8].mxu0 }
 0x285   :  { %v2237_v4 = vadd.f32 %v343_v3, %v2228_v56  ;;  %v1674_v5 = vpop.f32.mrb[9].mxu0 }
 0x286   :  { %v346_v6 = vpop.f32.mrb[10].mxu0 }
 0x287   :  { %v2240_v7 = vadd.f32 %v346_v6, %v2230_v58  ;;  %v1675_v8 = vpop.f32.mrb[11].mxu0  ;;  %v350_v9 = vsel %vm224_vm3, %v2237_v4, -inf }
 0x288   :  { %351 = vmax.xlane.f32.xlu0 %v350_v9 }
 0x289   :  { %v353_v10 = vsel %vm224_vm3, %v2240_v7, -inf }
 0x28c   :  { %v475_v12 = vpop.f32.mrb[12].mxu0  ;;  %354 = vmax.xlane.f32.xlu0 %v353_v10 }
 0x28d   :  { %v2247_v13 = vadd.f32 %v475_v12, %v2228_v56  ;;  %v1686_v14 = vpop.f32.mrb[13].mxu0 }
 0x28e   :  { %v478_v15 = vpop.f32.mrb[14].mxu0 }
 0x28f   :  { %v2250_v16 = vadd.f32 %v478_v15, %v2230_v58  ;;  %v1687_v17 = vpop.f32.mrb[15].mxu0  ;;  %v482_v18 = vsel %vm224_vm3, %v2247_v13, -inf }
 0x290   :  { %483 = vmax.xlane.f32.xlu1 %v482_v18 }
 0x291   :  { %v485_v19 = vsel %vm224_vm3, %v2250_v16, -inf }
 0x292   :  { %486 = vmax.xlane.f32.xlu0 %v485_v19 }
 0x294   :  { %v607_v20 = vpop.f32.mrb[16].mxu0 }
 0x295   :  { %v2257_v21 = vadd.f32 %v607_v20, %v2228_v56  ;;  %v1698_v22 = vpop.f32.mrb[17].mxu0 }
 0x296   :  { %v610_v23 = vpop.f32.mrb[18].mxu0 }
 0x297   :  { %v2260_v25 = vadd.f32 %v610_v23, %v2230_v58  ;;  %v1699_v26 = vpop.f32.mrb[19].mxu0  ;;  %v614_v27 = vsel %vm224_vm3, %v2257_v21, -inf }
 0x298   :  { %615 = vmax.xlane.f32.xlu1 %v614_v27 }
 0x299   :  { %v617_v28 = vsel %vm224_vm3, %v2260_v25, -inf }
 0x29a   :  { %618 = vmax.xlane.f32.xlu0 %v617_v28 }
 0x29c   :  { %v739_v29 = vpop.f32.mrb[20].mxu0 }
 0x29d   :  { %v2267_v30 = vadd.f32 %v739_v29, %v2228_v56  ;;  %v1710_v31 = vpop.f32.mrb[21].mxu0 }
 0x29e   :  { %v742_v33 = vpop.f32.mrb[22].mxu0 }
 0x29f   :  { %v2270_v34 = vadd.f32 %v742_v33, %v2230_v58  ;;  %v1711_v35 = vpop.f32.mrb[23].mxu0  ;;  %v746_v36 = vsel %vm224_vm3, %v2267_v30, -inf }
 0x2a0   :  { %747 = vmax.xlane.f32.xlu1 %v746_v36 }
 0x2a1   :  { %v749_v37 = vsel %vm224_vm3, %v2270_v34, -inf }
 0x2a2   :  { %750 = vmax.xlane.f32.xlu0 %v749_v37 }
 0x2a3   :  { %v227_v38 = vpop.xlane.xlu0 %226 }
 0x2a4   :  { %v231_v39 = vsub.f32 %v218_v59, %v227_v38  ;;  %v871_v40 = vpop.f32.mrb[24].mxu0 }
 0x2a5   :  { %v2277_v41 = vadd.f32 %v871_v40, %v2228_v56  ;;  %v230_v42 = vpop.xlane.xlu1 %229  ;;  %v1722_v43 = vpop.f32.mrb[25].mxu0 }
 0x2a6   :  { %v233_v44 = vmul.f32 1.442695, %v231_v39  ;;  %v232_v45 = vsub.f32 %v221_v62, %v230_v42  ;;  %v874_v46 = vpop.f32.mrb[26].mxu0 }
 0x2a7   :  { %v2280_v47 = vadd.f32 %v874_v46, %v2230_v58  ;;  %v1723_v48 = vpop.f32.mrb[27].mxu0  ;;  %v878_v49 = vsel %vm224_vm3, %v2277_v41, -inf }
 0x2a8   :  { %1843 = vpow2.f32 %v233_v44  ;;  %v235_v50 = vmul.f32 1.442695, %v232_v45  ;;  %879 = vmax.xlane.f32.xlu1 %v878_v49 }
 0x2a9   :  { %v881_v51 = vsel %vm224_vm3, %v2280_v47, -inf }
 0x2aa   :  { %1845 = vpow2.f32 %v235_v50  ;;  %882 = vmax.xlane.f32.xlu0 %v881_v51 }
 0x2ac   :  { %v1003_v52 = vpop.f32.mrb[28].mxu0 }
 0x2ad   :  { %v2287_v53 = vadd.f32 %v1003_v52, %v2228_v56  ;;  %v1734_v54 = vpop.f32.mrb[29].mxu0 }
 0x2ae   :  { %v1006_v55 = vpop.f32.mrb[30].mxu0 }
 0x2af   :  { %v2290_v57 = vadd.f32 %v1006_v55, %v2230_v58  ;;  %v1735_v59 = vpop.f32.mrb[31].mxu0  ;;  %v1010_v60 = vsel %vm224_vm3, %v2287_v53, -inf }
 0x2b0   :  { %1011 = vmax.xlane.f32.xlu1 %v1010_v60 }
 0x2b1   :  { %v1013_v61 = vsel %vm224_vm3, %v2290_v57, -inf }
 0x2b2   :  { %v2296_v62 = vpop.eup %1843  ;;  %1014 = vmax.xlane.f32.xlu0 %v1013_v61 }
 0x2b3   :  { %v237_v63 = vsel %vm224_vm3, %v2296_v62, 0.0 }
 0x2b4   :  { %v2300_v1 = vpop.eup %1845  ;;  %v1135_v2 = vpop.f32.mrb[32].mxu0  ;;  %238 = vadd.xlane.f32.xlu1 %v237_v63 }
 0x2b5   :  { %v2303_v3 = vadd.f32 %v1135_v2, %v2228_v56  ;;  %v1746_v5 = vpop.f32.mrb[33].mxu0  ;;  %v240_v6 = vsel %vm224_vm3, %v2300_v1, 0.0 }
 0x2b6   :  { %v1138_v8 = vpop.f32.mrb[34].mxu0  ;;  %241 = vadd.xlane.f32.xlu0 %v240_v6 }
 0x2b7   :  { %v2308_v9 = vadd.f32 %v1138_v8, %v2230_v58  ;;  %v1747_v10 = vpop.f32.mrb[35].mxu0  ;;  %v1142_v12 = vsel %vm224_vm3, %v2303_v3, -inf }
 0x2b8   :  { %1143 = vmax.xlane.f32.xlu1 %v1142_v12 }
 0x2b9   :  { %v1145_v14 = vsel %vm224_vm3, %v2308_v9, -inf }
 0x2ba   :  { %1146 = vmax.xlane.f32.xlu0 %v1145_v14 }
 0x2c9   :  { %505 = vrot.lane.b32.xlu1 %v2162_v32, %s2043_s19 }
 0x2d0   :  { %373 = vrot.lane.b32.xlu0 %v2162_v32, %s2041_s16 }
 0x315   :  { %v352_v56 = vpop.xlane.xlu0 %351 }
 0x316   :  { %v356_v15 = vsub.f32 %v2237_v4, %v352_v56 }
 0x318   :  { %v358_v58 = vmul.f32 1.442695, %v356_v15 }
 0x319   :  { %v355_v17 = vpop.xlane.xlu0 %354 }
 0x31a   :  { %1847 = vpow2.f32 %v358_v58  ;;  %v357_v18 = vsub.f32 %v2240_v7, %v355_v17 }
 0x31c   :  { %v360_v19 = vmul.f32 1.442695, %v357_v18 }
 0x31d   :  { %v484_v20 = vpop.xlane.xlu1 %483 }
 0x31e   :  { %1849 = vpow2.f32 %v360_v19  ;;  %v488_v22 = vsub.f32 %v2247_v13, %v484_v20 }
 0x31f   :  { %v487_v23 = vpop.xlane.xlu0 %486 }
 0x320   :  { %v490_v26 = vmul.f32 1.442695, %v488_v22  ;;  %v489_v27 = vsub.f32 %v2250_v16, %v487_v23 }
 0x322   :  { %1851 = vpow2.f32 %v490_v26  ;;  %v492_v28 = vmul.f32 1.442695, %v489_v27 }
 0x324   :  { %v2322_v29 = vpop.eup %1847  ;;  %1853 = vpow2.f32 %v492_v28 }
 0x325   :  { %v616_v4 = vpop.xlane.xlu1 %615  ;;  %v362_v31 = vsel %vm224_vm3, %v2322_v29, 0.0 }
 0x326   :  { %v620_v7 = vsub.f32 %v2257_v21, %v616_v4  ;;  %363 = vadd.xlane.f32.xlu1 %v362_v31 }
 0x327   :  { %v619_v33 = vpop.xlane.xlu0 %618 }
 0x328   :  { %v2327_v35 = vpop.eup %1849  ;;  %v622_v13 = vmul.f32 1.442695, %v620_v7  ;;  %v621_v36 = vsub.f32 %v2260_v25, %v619_v33 }
 0x329   :  { %v365_v16 = vsel %vm224_vm3, %v2327_v35, 0.0 }
 0x32a   :  { %1855 = vpow2.f32 %v622_v13  ;;  %v624_v37 = vmul.f32 1.442695, %v621_v36  ;;  %366 = vadd.xlane.f32.xlu0 %v365_v16 }
 0x32c   :  { %v2332_v38 = vpop.eup %1851  ;;  %1857 = vpow2.f32 %v624_v37 }
 0x32d   :  { %v748_v39 = vpop.xlane.xlu1 %747  ;;  %v494_v21 = vsel %vm224_vm3, %v2332_v38, 0.0 }
 0x32e   :  { %v2336_v40 = vpop.eup %1853  ;;  %v752_v42 = vsub.f32 %v2267_v30, %v748_v39  ;;  %495 = vadd.xlane.f32.xlu1 %v494_v21 }
 0x32f   :  { %v751_v43 = vpop.xlane.xlu0 %750  ;;  %v497_v25 = vsel %vm224_vm3, %v2336_v40, 0.0 }
 0x330   :  { %v754_v44 = vmul.f32 1.442695, %v752_v42  ;;  %v753_v45 = vsub.f32 %v2270_v34, %v751_v43  ;;  %498 = vadd.xlane.f32.xlu0 %v497_v25 }
 0x332   :  { %1859 = vpow2.f32 %v754_v44  ;;  %v756_v46 = vmul.f32 1.442695, %v753_v45 }
 0x334   :  { %v2342_v48 = vpop.eup %1855  ;;  %1861 = vpow2.f32 %v756_v46 }
 0x335   :  { %v880_v49 = vpop.xlane.xlu1 %879  ;;  %v626_v50 = vsel %vm224_vm3, %v2342_v48, 0.0 }
 0x336   :  { %v2346_v51 = vpop.eup %1857  ;;  %v884_v30 = vsub.f32 %v2277_v41, %v880_v49  ;;  %627 = vadd.xlane.f32.xlu1 %v626_v50 }
 0x337   :  { %v883_v52 = vpop.xlane.xlu0 %882  ;;  %v629_v54 = vsel %vm224_vm3, %v2346_v51, 0.0 }
 0x338   :  { %v886_v34 = vmul.f32 1.442695, %v884_v30  ;;  %v885_v55 = vsub.f32 %v2280_v47, %v883_v52  ;;  %630 = vadd.xlane.f32.xlu0 %v629_v54 }
 0x33a   :  { %1863 = vpow2.f32 %v886_v34  ;;  %v888_v59 = vmul.f32 1.442695, %v885_v55 }
 0x33c   :  { %v2352_v60 = vpop.eup %1859  ;;  %1865 = vpow2.f32 %v888_v59 }
 0x33d   :  { %v1012_v61 = vpop.xlane.xlu1 %1011  ;;  %v758_v63 = vsel %vm224_vm3, %v2352_v60, 0.0 }
 0x33e   :  { %v2356_v2 = vpop.eup %1861  ;;  %v1016_v41 = vsub.f32 %v2287_v53, %v1012_v61  ;;  %759 = vadd.xlane.f32.xlu0 %v758_v63 }
 0x33f   :  { %v1015_v5 = vpop.xlane.xlu0 %1014  ;;  %v761_v10 = vsel %vm224_vm3, %v2356_v2, 0.0 }
 0x340   :  { %v1018_v6 = vmul.f32 1.442695, %v1016_v41  ;;  %v1017_v8 = vsub.f32 %v2290_v57, %v1015_v5 }
 0x341   :  { %v239_v47 = vpop.xlane.xlu1 %238 }
 0x342   :  { %1867 = vpow2.f32 %v1018_v6  ;;  %v1020_v12 = vmul.f32 1.442695, %v1017_v8  ;;  %762 = vadd.xlane.f32.xlu0 %v761_v10 }
 0x343   :  { %1869 = vrcp.f32 %v239_v47  ;;  %v242_v14 = vpop.xlane.xlu0 %241 }
 0x344   :  { %v2362_v56 = vpop.eup %1863  ;;  %1871 = vpow2.f32 %v1020_v12 }
 0x345   :  { %1873 = vrcp.f32 %v242_v14  ;;  %v1144_v15 = vpop.xlane.xlu1 %1143  ;;  %v890_v53 = vsel %vm224_vm3, %v2362_v56, 0.0 }
 0x346   :  { %v2366_v58 = vpop.eup %1865  ;;  %v1148_v57 = vsub.f32 %v2303_v3, %v1144_v15  ;;  %891 = vadd.xlane.f32.xlu1 %v890_v53 }
 0x347   :  { %v893_v17 = vsel %vm224_vm3, %v2366_v58, 0.0  ;;  %v1147_v26 = vpop.xlane.xlu0 %1146 }
 0x348   :  { %v1150_v18 = vmul.f32 1.442695, %v1148_v57  ;;  %894 = vadd.xlane.f32.xlu0 %v893_v17 }
 0x34a   :  { %1875 = vpow2.f32 %v1150_v18 }
 0x34b   :  { %v374_v33 = vpop.permute.xlu0 %373 }
 0x34c   :  { %v2371_v19 = vpop.eup %1867 }
 0x34d   :  { %v1870_v20 = vpop.eup %1869  ;;  %v1022_v22 = vsel %vm224_vm3, %v2371_v19, 0.0 }
 0x34e   :  { %v2375_v23 = vpop.eup %1871  ;;  %1023 = vadd.xlane.f32.xlu0 %v1022_v22  ;;  %v245_v3 = vmul.f32 %v1870_v20, %v2296_v62  ;;  %v1149_v62 = vsub.f32 %v2308_v9, %v1147_v26  ;;  %v506_v9 = vpop.permute.xlu1 %505 }
 0x34f   :  { %v1874_v27 = vpop.eup %1873  ;;  %v1025_v4 = vsel %vm224_vm3, %v2375_v23, 0.0 }
 0x350   :  { %v246_v28 = vmul.f32 %v1874_v27, %v2300_v1  ;;  %v1152_v1 = vmul.f32 1.442695, %v1149_v62 }
 0x352   :  { %1026 = vadd.xlane.f32.xlu0 %v1025_v4  ;;  %v247_v31 = vpack.c.bf16 %v246_v28, %v245_v3  ;;  %1877 = vpow2.f32 %v1152_v1 }
 0x354   :  { %v2381_v7 = vpop.eup %1875  ;;  %1667 = vmatmul.mubr.msk.bf16.vlgmr.msra.gmra.mrb[4].mxu1 %vm224_vm3, %v247_v31 }
 0x355   :  { %1677 = vmatpush3.bf16.msra.mxu1 %v374_v33  ;;  %v1154_v13 = vsel %vm224_vm3, %v2381_v7, 0.0  ;;  %1678 = vmatprep.mubr.msk.bf16.mxu1 %vm2035_vm1, %v2034_v11 }
 0x356   :  { %1155 = vadd.xlane.f32.xlu0 %v1154_v13  ;;  %1688 = vmatprep.subr.bf16.mxu1 %v2034_v11 }
 0x357   :  { %637 = vrot.lane.b32.xlu1 %v2162_v32, %s2045_s21 }
 0x35c   :  { %v2398_v36 = vpop.eup %1877 }
 0x35d   :  { %v1157_v32 = vsel %vm224_vm3, %v2398_v36, 0.0 }
 0x36c   :  { %769 = vrot.lane.b32.xlu0 %v2160_v24, %s2047_s23 }
 0x370   :  { %901 = vrot.lane.b32.xlu0 %v2160_v24, %s2048_s24 }
 0x374   :  { %1033 = vrot.lane.b32.xlu0 %v2160_v24, %s2032_s27 }
 0x378   :  { %1165 = vrot.lane.b32.xlu0 %v2160_v24, %s2028_s28 }
 0x37b   :  { %1158 = vadd.xlane.f32.xlu1 %v1157_v32 }
 0x3b3   :  { %v364_v16 = vpop.xlane.xlu1 %363 }
 0x3b4   :  { %1879 = vrcp.f32 %v364_v16 }
 0x3b7   :  { %v367_v37 = vpop.xlane.xlu0 %366 }
 0x3b8   :  { %1881 = vrcp.f32 %v367_v37 }
 0x3bb   :  { %v496_v39 = vpop.xlane.xlu1 %495 }
 0x3bc   :  { %1883 = vrcp.f32 %v496_v39 }
 0x3bd   :  { %v499_v21 = vpop.xlane.xlu0 %498 }
 0x3be   :  { %1885 = vrcp.f32 %v499_v21  ;;  %v1880_v42 = vpop.eup %1879 }
 0x3bf   :  { %v370_v25 = vmul.f32 %v1880_v42, %v2322_v29 }
 0x3c2   :  { %v1882_v43 = vpop.eup %1881 }
 0x3c3   :  { %v371_v44 = vmul.f32 %v1882_v43, %v2327_v35  ;;  %v628_v49 = vpop.xlane.xlu1 %627 }
 0x3c5   :  { %v631_v24 = vpop.xlane.xlu0 %630  ;;  %v372_v45 = vpack.c.bf16 %v371_v44, %v370_v25 }
 0x3c6   :  { %v1884_v46 = vpop.eup %1883  ;;  %1887 = vrcp.f32 %v631_v24 }
 0x3c7   :  { %1679 = vmatmul.mubr.msk.bf16.vlgmr.msra.gmra.mrb[8].mxu1 %vm224_vm3, %v372_v45  ;;  %1889 = vrcp.f32 %v628_v49  ;;  %v502_v29 = vmul.f32 %v1884_v46, %v2332_v38 }
 0x3c8   :  { %v1886_v50 = vpop.eup %1885  ;;  %1689 = vmatpush3.bf16.msra.mxu1 %v506_v9  ;;  %1690 = vmatprep.mubr.msk.bf16.mxu1 %vm2035_vm1, %v2034_v11 }
 0x3c9   :  { %v503_v30 = vmul.f32 %v1886_v50, %v2336_v40  ;;  %1700 = vmatprep.subr.bf16.mxu1 %v2034_v11  ;;  %v1833_v50 = vld [vmem:[#allocation8 + $0x20] ss:$8 sps:$4 sm:$0xff]  }
 0x3ca   :  { %1755 = vmatpush3.bf16.msra.mxu0 %v1833_v50  ;;  %v1445_v50 = vld [vmem:[#allocation9 + $0x10] sm:$0xff] }
 0x3cb   :  { %v760_v35 = vpop.xlane.xlu0 %759  ;;  %v504_v52 = vpack.c.bf16 %v503_v30, %v502_v29  ;;  %1756 = vmatprep.subr.bf16.mxu0 %v2034_v11 }
 0x3cf   :  { %1691 = vmatmul.mubr.msk.bf16.vlgmr.msra.gmra.mrb[12].mxu1 %vm224_vm3, %v504_v52  ;;  %v763_v34 = vpop.xlane.xlu0 %762 }
 0x3d0   :  { %1702 = vmatprep.mubr.msk.bf16.mxu1 %vm2035_vm1, %v2034_v11  ;;  %v1888_v54 = vpop.eup %1887  ;;  %1891 = vrcp.f32 %v763_v34 }
 0x3d1   :  { %v1890_v59 = vpop.eup %1889  ;;  %v635_v61 = vmul.f32 %v1888_v54, %v2346_v51  ;;  %1893 = vrcp.f32 %v760_v35 }
 0x3d2   :  { %v634_v40 = vmul.f32 %v1890_v59, %v2342_v48 }
 0x3d3   :  { %v892_v55 = vpop.xlane.xlu1 %891 }
 0x3d4   :  { %v636_v38 = vpack.c.bf16 %v635_v61, %v634_v40  ;;  %v1834_v61 = vld [vmem:[#allocation8 + $0x30] ss:$8 sps:$4 sm:$0xff]   ;;  %v1835_v40 = vld [vmem:[#allocation8 + $0x40] ss:$8 sps:$4 sm:$0xff]  }
 0x3d5   :  { %v895_v63 = vpop.xlane.xlu0 %894  ;;  %1757 = vmatpush3.bf16.msra.mxu0 %v1834_v61 }
 0x3d6   :  { %1895 = vrcp.f32 %v895_v63  ;;  %1758 = vmatprep.subr.bf16.mxu0 %v2034_v11  ;;  %v1836_v63 = vld [vmem:[#allocation8 + $0x50] ss:$8 sps:$4 sm:$0xff]  }
 0x3d7   :  { %v638_v41 = vpop.permute.xlu1 %637  ;;  %1897 = vrcp.f32 %v892_v55 }
 0x3d8   :  { %1701 = vmatpush3.bf16.msra.mxu1 %v638_v41 }
 0x3d9   :  { %1712 = vmatprep.subr.bf16.mxu1 %v2034_v11  ;;  %1759 = vmatpush3.bf16.msra.mxu0 %v1835_v40 }
 0x3da   :  { %v1892_v8 = vpop.eup %1891  ;;  %1760 = vmatprep.subr.bf16.mxu0 %v2034_v11 }
 0x3db   :  { %v1024_v5 = vpop.xlane.xlu0 %1023  ;;  %1703 = vmatmul.mubr.msk.bf16.vlgmr.msra.gmra.mrb[16].mxu1 %vm224_vm3, %v636_v38  ;;  %v1894_v48 = vpop.eup %1893  ;;  %v767_v47 = vmul.f32 %v1892_v8, %v2356_v2  ;;  %v1837_v38 = vld [vmem:[#allocation8 + $0x60] ss:$8 sps:$4 sm:$0xff]   ;;  %v1838_v8 = vld [vmem:[#allocation8 + $0x70] ss:$8 sps:$4 sm:$0xff]  }
 0x3dc   :  { %1714 = vmatprep.mubr.msk.bf16.mxu1 %vm2035_vm1, %v2034_v11  ;;  %v766_v10 = vmul.f32 %v1894_v48, %v2352_v60 }
 0x3dd   :  { %1761 = vmatpush3.bf16.msra.mxu0 %v1836_v63 }
 0x3de   :  { %v768_v14 = vpack.c.bf16 %v767_v47, %v766_v10  ;;  %1778 = vmatprep.subr.bf16.mxu0 %v2034_v11 }
 0x3df   :  { %v1027_v6 = vpop.xlane.xlu0 %1026 }
 0x3e0   :  { %1899 = vrcp.f32 %v1027_v6  ;;  %v1896_v15 = vpop.eup %1895 }
 0x3e1   :  { %1901 = vrcp.f32 %v1024_v5  ;;  %v1898_v57 = vpop.eup %1897  ;;  %v899_v2 = vmul.f32 %v1896_v15, %v2366_v58 }
 0x3e2   :  { %v898_v60 = vmul.f32 %v1898_v57, %v2362_v56 }
 0x3e3   :  { %v1156_v51 = vpop.xlane.xlu0 %1155 }
 0x3e4   :  { %v900_v17 = vpack.c.bf16 %v899_v2, %v898_v60  ;;  %1903 = vrcp.f32 %v1156_v51 }
 0x3e7   :  { %v770_v12 = vpop.permute.xlu0 %769 }
 0x3e8   :  { %1713 = vmatpush3.bf16.msra.mxu1 %v770_v12 }
 0x3e9   :  { %1724 = vmatprep.subr.bf16.mxu1 %v2034_v11 }
 0x3ea   :  { %v1900_v18 = vpop.eup %1899 }
 0x3eb   :  { %v902_v53 = vpop.permute.xlu0 %901  ;;  %1715 = vmatmul.mubr.msk.bf16.vlgmr.msra.gmra.mrb[20].mxu1 %vm224_vm3, %v768_v14  ;;  %v1902_v22 = vpop.eup %1901  ;;  %v1031_v26 = vmul.f32 %v1900_v18, %v2375_v23 }
 0x3ec   :  { %1725 = vmatpush3.bf16.msra.mxu1 %v902_v53  ;;  %1726 = vmatprep.mubr.msk.bf16.mxu1 %vm2035_vm1, %v2034_v11  ;;  %v1030_v58 = vmul.f32 %v1902_v22, %v2371_v19 }
 0x3ed   :  { %1736 = vmatprep.subr.bf16.mxu1 %v2034_v11 }
 0x3ee   :  { %v1032_v27 = vpack.c.bf16 %v1031_v26, %v1030_v58  ;;  %v1904_v28 = vpop.eup %1903 }
 0x3ef   :  { %v1034_v20 = vpop.permute.xlu0 %1033  ;;  %v1162_v23 = vmul.f32 %v1904_v28, %v2381_v7  ;;  %v1234_v28 = vld [vmem:[#allocation9 + $0x1] ss:$0 sm:$0xff] }
 0x3f3   :  { %1727 = vmatmul.mubr.msk.bf16.vlgmr.msra.gmra.mrb[24].mxu1 %vm224_vm3, %v900_v17  ;;  %v1166_v3 = vpop.permute.xlu0 %1165 }
 0x3f4   :  { %1737 = vmatpush3.bf16.msra.mxu1 %v1034_v20  ;;  %1738 = vmatprep.mubr.msk.bf16.mxu1 %vm2035_vm1, %v2034_v11 }
 0x3f5   :  { %1748 = vmatprep.subr.bf16.mxu1 %v2034_v11 }
 0x3fb   :  { %1739 = vmatmul.mubr.msk.bf16.vlgmr.msra.gmra.mrb[28].mxu1 %vm224_vm3, %v1032_v27 }
 0x3fc   :  { %1749 = vmatpush3.bf16.msra.mxu1 %v1166_v3  ;;  %1750 = vmatprep.mubr.msk.bf16.mxu1 %vm2035_vm1, %v2034_v11  ;;  %v1839_v3 = vld [vmem:[#allocation8 + $0x80] ss:$8 sps:$4 sm:$0xff]  }
 0x3fd   :  { %1766 = vmatprep.subr.bf16.mxu1 %v2034_v11 }
 0x408   :  { %v1159_v56 = vpop.xlane.xlu1 %1158 }
 0x409   :  { %1905 = vrcp.f32 %v1159_v56  ;;  %v1840_v56 = vld [vmem:[#allocation8 + $0x90] ss:$8 sps:$4 sm:$0xff]  }
 0x413   :  { %v1906_v4 = vpop.eup %1905 }
 0x414   :  { %v1163_v31 = vmul.f32 %v1906_v4, %v2398_v36 }
 0x416   :  { %v1164_v19 = vpack.c.bf16 %v1163_v31, %v1162_v23 }
 0x418   :  { %1751 = vmatmul.mubr.msk.bf16.vlgmr.msra.gmra.mrb[32].mxu1 %vm224_vm3, %v1164_v19 }
 0x419   :  { %1774 = vmatprep.mubr.msk.bf16.mxu1 %vm2035_vm1, %v2034_v11  ;;  %1767 = vmatpush3.bf16.msra.mxu1 %v1837_v38  ;;  %v1479_v38 = vld [vmem:[#allocation9] sm:$0x30] }
 0x41a   :  { %1768 = vmatprep.subr.bf16.mxu1 %v2034_v11 }
 0x41d   :  { %1769 = vmatpush3.bf16.msra.mxu1 %v1838_v8  ;;  %v1480_v8 = vld [vmem:[#allocation9 + $0x3] ss:$0 sm:$0xff] }
 0x41e   :  { %1770 = vmatprep.subr.bf16.mxu1 %v2034_v11 }
 0x421   :  { %1771 = vmatpush3.bf16.msra.mxu1 %v1839_v3 }
 0x422   :  { %1772 = vmatprep.subr.bf16.mxu1 %v2034_v11 }
 0x425   :  { %1773 = vmatpush3.bf16.msra.mxu1 %v1840_v56 }
 0x427   :  { %v289_v33 = vpop.f32.mrb[4].mxu1 }
 0x428   :  { %296 = vst.msk [vmem:[#allocation2] sm:$0xff] %vm176_vm2, %v289_v33  ;;  %v1668_v13 = vpop.f32.mrb[5].mxu1 }
 0x429   :  { %v292_v62 = vpop.f32.mrb[6].mxu1 }
 0x42a   :  { %297 = vst.msk [vmem:[#allocation2 + $0x8] sm:$0xff] %vm176_vm2, %v292_v62  ;;  %v1669_v1 = vpop.f32.mrb[7].mxu1 }
 0x42b   :  { %v1841_v1 = vld [vmem:[#allocation8 + $0xa0] ss:$8 sps:$4 sm:$0xff]  }
 0x49a   :  { %v413_v32 = vpop.f32.mrb[8].mxu1 }
 0x49b   :  { %422 = vrot.lane.b32.xlu0 %v413_v32, %s2028_s28  ;;  %v1680_v7 = vpop.f32.mrb[9].mxu1  ;;  %v1842_v32 = vld [vmem:[#allocation8 + $0xb0] ss:$8 sps:$4 sm:$0xff]  }
 0x49c   :  { %v416_v9 = vpop.f32.mrb[10].mxu1  ;;  %v2049_v7 = vmov 1  }
 0x49d   :  { %424 = vrot.lane.b32.xlu1 %v416_v9, %s2028_s28  ;;  %v1681_v36 = vpop.f32.mrb[11].mxu1  ;;  %1825 = vset.pattern.permute.xlu0 %v2049_v7  ;;  %v1313_v9 = vld [vmem:[#allocation9 + $0x2] ss:$0 sm:$0xff]  ;;  %s2051_s28 = smov 125  }
 0x49e   :  { %1824 = vset.pattern.permute.xlu1 %v2049_v7 }
 0x4a2   :  { %v545_v16 = vpop.f32.mrb[12].mxu1 }
 0x4a3   :  { %554 = vrot.lane.b32.xlu0 %v545_v16, %s2032_s27  ;;  %v1692_v37 = vpop.f32.mrb[13].mxu1 }
 0x4a4   :  { %v548_v39 = vpop.f32.mrb[14].mxu1 }
 0x4a5   :  { %v1693_v21 = vpop.f32.mrb[15].mxu1 }
 0x4a7   :  { %556 = vrot.lane.b32.xlu0 %v548_v39, %s2032_s27 }
 0x4ae   :  { %v677_v42 = vpop.f32.mrb[16].mxu1 }
 0x4af   :  { %686 = vrot.lane.b32.xlu0 %v677_v42, %s2048_s24  ;;  %v1704_v43 = vpop.f32.mrb[17].mxu1 }
 0x4b0   :  { %v680_v25 = vpop.f32.mrb[18].mxu1 }
 0x4b1   :  { %v1705_v44 = vpop.f32.mrb[19].mxu1 }
 0x4b3   :  { %688 = vrot.lane.b32.xlu0 %v680_v25, %s2048_s24 }
 0x4be   :  { %v809_v24 = vpop.f32.mrb[20].mxu1 }
 0x4bf   :  { %818 = vrot.lane.b32.xlu1 %v809_v24, %s2047_s23  ;;  %v1716_v45 = vpop.f32.mrb[21].mxu1 }
 0x4c0   :  { %v812_v46 = vpop.f32.mrb[22].mxu1 }
 0x4c1   :  { %820 = vrot.lane.b32.xlu0 %v812_v46, %s2047_s23  ;;  %v1717_v49 = vpop.f32.mrb[23].mxu1 }
 0x4c2   :  { %v2050_v49 = vmov 0.0|0.0  }
 0x4c3   :  { %1793 = vmatprep.subr.bf16.mxu1 %v2050_v49 }
 0x4c6   :  { %v941_v30 = vpop.f32.mrb[24].mxu1 }
 0x4c7   :  { %950 = vrot.lane.b32.xlu1 %v941_v30, %s2046_s22  ;;  %v1728_v29 = vpop.f32.mrb[25].mxu1 }
 0x4c8   :  { %v944_v35 = vpop.f32.mrb[26].mxu1  ;;  %v1446_v29 = vld [vmem:[#allocation9 + $0x20] sm:$0xff] }
 0x4c9   :  { %952 = vrot.lane.b32.xlu0 %v944_v35, %s2046_s22  ;;  %v1729_v52 = vpop.f32.mrb[27].mxu1 }
 0x4ce   :  { %v1073_v54 = vpop.f32.mrb[28].mxu1 }
 0x4cf   :  { %1082 = vrot.lane.b32.xlu1 %v1073_v54, %s2044_s20  ;;  %v1740_v34 = vpop.f32.mrb[29].mxu1 }
 0x4d0   :  { %v1076_v55 = vpop.f32.mrb[30].mxu1 }
 0x4d1   :  { %1084 = vrot.lane.b32.xlu0 %v1076_v55, %s2044_s20  ;;  %v1741_v59 = vpop.f32.mrb[31].mxu1 }
 0x4eb   :  { %v1205_v41 = vpop.f32.mrb[32].mxu1 }
 0x4ec   :  { %1214 = vrot.lane.b32.xlu1 %v1205_v41, %s2042_s17  ;;  %v1752_v5 = vpop.f32.mrb[33].mxu1 }
 0x4ed   :  { %v1208_v6 = vpop.f32.mrb[34].mxu1 }
 0x4ee   :  { %1216 = vrot.lane.b32.xlu0 %v1208_v6, %s2042_s17  ;;  %v1753_v51 = vpop.f32.mrb[35].mxu1  ;;  %v1482_v6 = vrot.slane %v1479_v38, 4 }
 0x50d   :  { %v423_v48 = vpop.permute.xlu0 %422 }
 0x50e   :  { %429 = vst.msk [vmem:[#allocation2] sm:$0xff] %vm428_vm4, %v423_v48 }
 0x50f   :  { %v425_v47 = vpop.permute.xlu1 %424 }
 0x510   :  { %430 = vst.msk [vmem:[#allocation2 + $0x8] sm:$0xff] %vm428_vm4, %v425_v47 }
 0x515   :  { %v555_v10 = vpop.permute.xlu0 %554 }
 0x516   :  { %561 = vst.msk [vmem:[#allocation2] sm:$0xff] %vm560_vm5, %v555_v10 }
 0x519   :  { %v557_v12 = vpop.permute.xlu0 %556 }
 0x51a   :  { %562 = vst.msk [vmem:[#allocation2 + $0x8] sm:$0xff] %vm560_vm5, %v557_v12 }
 0x521   :  { %v687_v14 = vpop.permute.xlu0 %686 }
 0x522   :  { %693 = vst.msk [vmem:[#allocation2] sm:$0xff] %vm692_vm6, %v687_v14 }
 0x525   :  { %v689_v15 = vpop.permute.xlu0 %688 }
 0x526   :  { %694 = vst.msk [vmem:[#allocation2 + $0x8] sm:$0xff] %vm692_vm6, %v689_v15 }
 0x531   :  { %v819_v53 = vpop.permute.xlu1 %818 }
 0x532   :  { %825 = vst.msk [vmem:[#allocation2] sm:$0xff] %vm824_vm7, %v819_v53 }
 0x533   :  { %v821_v57 = vpop.permute.xlu0 %820 }
 0x534   :  { %826 = vst.msk [vmem:[#allocation2 + $0x8] sm:$0xff] %vm824_vm7, %v821_v57 }
 0x539   :  { %v951_v2 = vpop.permute.xlu1 %950 }
 0x53a   :  { %957 = vst.msk [vmem:[#allocation2] sm:$0xff] %vm956_vm8, %v951_v2 }
 0x53b   :  { %v953_v60 = vpop.permute.xlu0 %952 }
 0x53c   :  { %958 = vst.msk [vmem:[#allocation2 + $0x8] sm:$0xff] %vm956_vm8, %v953_v60 }
 0x541   :  { %v1083_v17 = vpop.permute.xlu1 %1082 }
 0x542   :  { %1089 = vst.msk [vmem:[#allocation2] sm:$0xff] %vm1088_vm9, %v1083_v17 }
 0x543   :  { %v1085_v18 = vpop.permute.xlu0 %1084 }
 0x544   :  { %1090 = vst.msk [vmem:[#allocation2 + $0x8] sm:$0xff] %vm1088_vm9, %v1085_v18 }
 0x55e   :  { %v1215_v20 = vpop.permute.xlu1 %1214 }
 0x55f   :  { %1221 = vst.msk [vmem:[#allocation2] sm:$0xff] %vm1220_vm10, %v1215_v20 }
 0x560   :  { %v1217_v22 = vpop.permute.xlu0 %1216 }
 0x561   :  { %1222 = vst.msk [vmem:[#allocation2 + $0x8] sm:$0xff] %vm1220_vm10, %v1217_v22 }
 0x566   :  { %v1223_v26 = vld [vmem:[#allocation2] sm:$0xff] }
 0x568   :  { %v1224_v58 = vld [vmem:[#allocation2 + $0x8] sm:$0xff] }
 0x569   :  { %v1225_v27 = vpack.c.bf16 %v1224_v58, %v1223_v26 }
 0x56b   :  { %1763 = vmatmul.mubr.msk.bf16.vlgmr.msra.gmra.mrb[36].mxu0 %vm1259_vm11, %v1225_v27 }
 0x56c   :  { %1782 = vmatprep.mubr.msk.bf16.mxu0 %vm2035_vm1, %v2034_v11  ;;  %1779 = vmatpush3.bf16.msra.mxu0 %v1841_v1 }
 0x56d   :  { %1780 = vmatprep.subr.bf16.mxu0 %v2034_v11 }
 0x570   :  { %1781 = vmatpush3.bf16.msra.mxu0 %v1842_v32 }
 0x63e   :  { %v1297_v4 = vpop.f32.mrb[36].mxu0 }
 0x63f   :  { %v1764_v23 = vpop.f32.mrb[37].mxu0  ;;  %v1298_v19 = vadd.f32 %v1297_v4, %v1234_v28 }
 0x640   :  { %v1300_v31 = vpop.f32.mrb[38].mxu0 }
 0x641   :  { %v1301_v33 = vadd.f32 %v1300_v31, %v1234_v28  ;;  %v1765_v13 = vpop.f32.mrb[39].mxu0 }
 0x643   :  { %v1304_v62 = vpack.c.bf16 %v1301_v33, %v1298_v19 }
 0x645   :  { %1775 = vmatmul.mubr.msk.bf16.vlgmr.msra.gmra.mrb[36].mxu1 %vm1259_vm11, %v1304_v62 }
 0x646   :  { %1790 = vmatprep.mubr.msk.f32.mxu1 %vm2035_vm1, %v2034_v11 }
 0x718   :  { %v1375_v36 = vpop.f32.mrb[36].mxu1 }
 0x719   :  { %v1376_v16 = vadd.f32 %v1375_v36, %v1313_v9  ;;  %v1776_v37 = vpop.f32.mrb[37].mxu1 }
 0x71a   :  { %v1378_v39 = vpop.f32.mrb[38].mxu1 }
 0x71b   :  { %v1379_v21 = vadd.f32 %v1378_v39, %v1313_v9  ;;  %v1777_v42 = vpop.f32.mrb[39].mxu1  ;;  %v1382_v43 = vmax.f32 %v1376_v16, 0.0 }
 0x71d   :  { %v1383_v25 = vmax.f32 %v1379_v21, 0.0 }
 0x71f   :  { %v1384_v44 = vpack.c.bf16 %v1383_v25, %v1382_v43 }
 0x721   :  { %1783 = vmatmul.mubr.msk.bf16.vlgmr.msra.gmra.mrb[40].mxu0 %vm116_vm0, %v1384_v44 }
 0x7f4   :  { %v1438_v24 = vpop.f32.mrb[40].mxu0 }
 0x7f5   :  { %1460 = vperm.xlu1 %1824, %v1438_v24   ;;  %v1784_v11 = vpop.f32.mrb[41].mxu0 }
 0x7f6   :  { %v1441_v45 = vpop.f32.mrb[42].mxu0 }
 0x7f7   :  { %1464 = vperm.xlu0 %1825, %v1441_v45   ;;  %v1785_v46 = vpop.f32.mrb[43].mxu0 }
 0x7f9   :  { %1826 = vset.pattern.permute.xlu1 %v2033_v0 }
 0x7fa   :  { %1449 = vperm.xlu1 %1826, %v1438_v24  }
 0x7fe   :  { %1454 = vperm.xlu1 %1826, %v1441_v45  }
 0x874   :  { %v1461_v30 = vpop.permute.xlu1 %1460 }
 0x875   :  { %v1467_v35 = vmul.f32 %v1461_v30, %v1445_v50 }
 0x876   :  { %v1465_v52 = vpop.permute.xlu0 %1464 }
 0x877   :  { %v1468_v54 = vmul.f32 %v1465_v52, %v1446_v29  ;;  %1471 = vrot.lane.b32.xlu0 %v1467_v35, %s2051_s28 }
 0x879   :  { %1473 = vrot.lane.b32.xlu1 %v1468_v54, %s2051_s28  ;;  %v1450_v34 = vpop.permute.xlu1 %1449 }
 0x87a   :  { %v1457_v61 = vmul.f32 %v1450_v34, %v1445_v50 }
 0x87d   :  { %v1455_v55 = vpop.permute.xlu1 %1454 }
 0x87e   :  { %v1458_v40 = vmul.f32 %v1455_v55, %v1446_v29 }
 0x8e9   :  { %v1472_v59 = vpop.permute.xlu0 %1471 }
 0x8ea   :  { %v1477_v0 = vadd.f32 %v1472_v59, %v1457_v61 }
 0x8eb   :  { %v1474_v63 = vpop.permute.xlu1 %1473 }
 0x8ec   :  { %v1478_v41 = vadd.f32 %v1474_v63, %v1458_v40 }
 0x8ee   :  { %v1794_v5 = vpack.c.bf16 %v1478_v41, %v1477_v0 }
 0x8f0   :  { %1795 = vmatpush3.bf16.msra.mxu1 %v1794_v5 }
 0x8f3   :  { %1791 = vmatmul.mubr.msk.f32.vlgmr.msra.gmra.mrb[40].mxu1 %vm224_vm3, %v1482_v6 }
 0x9c6   :  { %v1551_v51 = vpop.f32.mrb[40].mxu1 }
 0x9c7   :  { %v1552_v48 = vadd.f32 %v1551_v51, %v1480_v8  ;;  %v1792_v47 = vpop.f32.mrb[41].mxu1 }
 0x9c9   :  { %1556 = vst.msk [vmem:[#allocation11] sm:$0x3] %vm1555_vm12, %v1552_v48 }
 0x9ca   :  { %2006 = shalt.err (!%p2003_p8)
}
 0x9cb   :  { %s2007_s30 = scalar_lea.hbm %s2494_s4, 32 }
 0x9cc   :  { %p2008_p9 = scmp.ne.s32.totalorder %s2494_s4, %s2007_s30  ;;  %p2011_p10 = scmp.lt.u32.totalorder %s2007_s30, %s2494_s4 }
 0x9ce   :  { %p2013_p11 = pnand %p2011_p10, %p2008_p9 }
 0x9d0   :  { %2016 = shalt.err (!%p2013_p11)
}
 0x9d1   :  { %1566 = dma.vmem_to_hbm [thread:$0]  %s1564_s0, 32, %s2494_s4, [#allocation5]  }
 0x9d2   :  { %2023 = dma.done.wait [#allocation5], 32  }
 0x9d3   :  { %2024 = vsyncadd [#allocation5], 4294967264 }
 0x9d4   :  { %1570 = vsyncpa [#allocation4], 1 }
 0x9d5   :  { %1571 = vsyncpa [#allocation7], 1 }
 0x9d6   :  { %1572 = vsyncpa [#allocation10], 1 }
 0x9d7   :  { %1573 = vsyncpa [#allocation5], 1 }

</bundles_post_ra>
